<compile_context>
chip_gen: v7x
topology: tpu7x:2x2x1
jax: 0.10.0
libtpu: 0.0.40
codegen_flags: <defaults>
</compile_context>

<pallas_src>
import math
from dataclasses import dataclass
from functools import partial

import jax
import jax.numpy as jnp
from jax import lax
from jax.experimental import pallas as pl
from jax.experimental.pallas import tpu as pltpu


def _scoped_vmem_limit():
    """64 MiB scoped VMEM on 128-MiB parts (v5e/v6e), 32 MiB on 64-MiB parts (v7x)."""
    try:
        cap = getattr(pltpu.get_tpu_info(), "vmem_capacity_bytes", None)
    except Exception:
        cap = None
    if cap is not None and cap >= 96 * 1024 * 1024:
        return 64 * 1024 * 1024
    return 32 * 1024 * 1024


VMEM_LIMIT_BYTES = _scoped_vmem_limit()


# ----------------------------- config ---------------------------------------


@dataclass
class FalconConfig:
    vocab_size: int = 128
    hidden_size: int = 64
    n_head: int = 4
    n_layer: int = 2
    layer_norm_epsilon: float = 1e-5
    rope_theta: float = 10000.0
    rope_scaling = None   # only used by the decode path (not implemented here)


# ----------------------------- tiling helpers --------------------------------


def _round_up(x, m):
    return ((x + m - 1) // m) * m


def _tile_pad(dim, target, multiple):
    """Return (tile, padded_dim).  dim <= target -> single full-dim block; otherwise a
    128-multiple tile with the array zero-padded to a tile multiple (never a huge full-dim block)."""
    if dim <= target:
        return dim, dim
    t = (target // multiple) * multiple
    padded = _round_up(dim, t)
    return t, padded


def _pick_divisor_tile(dim, target, multiple):
    """Largest t <= target with t % multiple == 0 and dim % t == 0; else the full dim."""
    if dim <= target or dim % multiple != 0:
        return dim
    t = (target // multiple) * multiple
    while t >= multiple:
        if dim % t == 0:
            return t
        t -= multiple
    return dim


def _gelu(y):
    # exact GELU (erf form), matching torch.nn.GELU() default
    return 0.5 * y * (1.0 + lax.erf(y * 0.7071067811865476))


# ----------------------------- Pallas kernels -------------------------------


def _ln_matmul_kernel(x_ref, g_ref, b_ref, w_ref, o_ref, ln_sc, *, eps, gelu_from, tn):
    """out = LayerNorm(x) @ W, with GELU applied to columns >= gelu_from (if not None).

    grid = (M tiles, N tiles); LayerNorm is computed once per M tile (at j == 0, N axis is
    'arbitrary' so it runs sequentially per core) and cached in a bf16 VMEM scratch that is
    reused for every N tile -- no redundant cross-lane LN reductions per output tile."""
    @pl.when(pl.program_id(1) == 0)
    def _():
        x = x_ref[...].astype(jnp.float32)                     # (tm, K) f32
        mean = jnp.mean(x, axis=-1, keepdims=True)
        xc = x - mean
        var = jnp.mean(xc * xc, axis=-1, keepdims=True)
        ln = xc * lax.rsqrt(var + eps) * g_ref[...] + b_ref[...]
        ln_sc[...] = ln.astype(jnp.bfloat16)

    y = jnp.dot(ln_sc[...], w_ref[...], preferred_element_type=jnp.float32)
    if gelu_from is not None:
        if gelu_from <= 0:
            y = _gelu(y)
        else:
            col = lax.broadcasted_iota(jnp.int32, y.shape, 1) + pl.program_id(1) * tn
            y = jnp.where(col >= gelu_from, _gelu(y), y)
    o_ref[...] = y.astype(o_ref.dtype)


def ln_linear(x2d, gamma, beta, w, *, eps, gelu_from=None, out_dtype=None):
    """Fused LayerNorm + linear.  x2d: (M, K) f32, w: (K, N) bf16 -> (M, N)."""
    M, K = x2d.shape
    K2, N = w.shape
    assert K == K2
    out_dtype = out_dtype or x2d.dtype

    tm = min(256, _round_up(M, 16))
    Mp = _round_up(M, tm)
    tn, Np = _tile_pad(N, 512, 128)

    if Mp != M:
        x2d = jnp.pad(x2d, ((0, Mp - M), (0, 0)))
    if Np != N:
        w = jnp.pad(w, ((0, 0), (0, Np - N)))

    out = pl.pallas_call(
        partial(_ln_matmul_kernel, eps=eps, gelu_from=gelu_from, tn=tn),
        out_shape=jax.ShapeDtypeStruct((Mp, Np), out_dtype),
        grid=(Mp // tm, Np // tn),
        in_specs=[
            pl.BlockSpec((tm, K), lambda i, j: (i, 0)),
            pl.BlockSpec((1, K), lambda i, j: (0, 0)),
            pl.BlockSpec((1, K), lambda i, j: (0, 0)),
            pl.BlockSpec((K, tn), lambda i, j: (0, j)),
        ],
        out_specs=pl.BlockSpec((tm, tn), lambda i, j: (i, j)),
        scratch_shapes=[pltpu.VMEM((tm, K), jnp.bfloat16)],
        compiler_params=pltpu.CompilerParams(
            dimension_semantics=("parallel", "arbitrary"),   # LN cache needs sequential N sweep
            vmem_limit_bytes=VMEM_LIMIT_BYTES,
        ),
    )(x2d, gamma.reshape(1, K), beta.reshape(1, K), w)
    if Mp != M or Np != N:
        out = out[:M, :N]
    return out


def _matmul_kernel(x_ref, w_ref, o_ref, acc_ref):
    @pl.when(pl.program_id(2) == 0)
    def _():
        acc_ref[...] = jnp.zeros_like(acc_ref)
    acc_ref[...] += jnp.dot(x_ref[...].astype(jnp.bfloat16), w_ref[...],
                            preferred_element_type=jnp.float32)

    @pl.when(pl.program_id(2) == pl.num_programs(2) - 1)
    def _():
        o_ref[...] = acc_ref[...].astype(o_ref.dtype)


def _matmul_res_kernel(x_ref, w_ref, r_ref, o_ref, acc_ref):
    @pl.when(pl.program_id(2) == 0)
    def _():
        acc_ref[...] = jnp.zeros_like(acc_ref)
    acc_ref[...] += jnp.dot(x_ref[...].astype(jnp.bfloat16), w_ref[...],
                            preferred_element_type=jnp.float32)

    @pl.when(pl.program_id(2) == pl.num_programs(2) - 1)
    def _():
        o_ref[...] = (acc_ref[...] + r_ref[...].astype(jnp.float32)).astype(o_ref.dtype)


def linear(x2d, w, *, residual=None, out_dtype=None):
    """Tiled x2d @ w (+ residual), (M, N, K) grid, f32 VMEM accumulator, 128-padded N/K."""
    M, K = x2d.shape
    K2, N = w.shape
    assert K == K2
    out_dtype = out_dtype or (residual.dtype if residual is not None else x2d.dtype)

    tm = min(256, _round_up(M, 16))
    Mp = _round_up(M, tm)
    tn, Np = _tile_pad(N, 512, 128)
    tk, Kp = _tile_pad(K, 512, 128)

    if Mp != M or Kp != K:
        x2d = jnp.pad(x2d, ((0, Mp - M), (0, Kp - K)))
    if Kp != K or Np != N:
        w = jnp.pad(w, ((0, Kp - K), (0, Np - N)))
    if residual is not None and (Mp != M or Np != N):
        residual = jnp.pad(residual, ((0, Mp - M), (0, Np - N)))

    in_specs = [
        pl.BlockSpec((tm, tk), lambda i, j, k: (i, k)),
        pl.BlockSpec((tk, tn), lambda i, j, k: (k, j)),
    ]
    operands = [x2d, w]
    if residual is not None:
        in_specs.append(pl.BlockSpec((tm, tn), lambda i, j, k: (i, j)))
        operands.append(residual)
        kernel = _matmul_res_kernel
    else:
        kernel = _matmul_kernel

    out = pl.pallas_call(
        kernel,
        out_shape=jax.ShapeDtypeStruct((Mp, Np), out_dtype),
        grid=(Mp // tm, Np // tn, Kp // tk),
        in_specs=in_specs,
        out_specs=pl.BlockSpec((tm, tn), lambda i, j, k: (i, j)),
        scratch_shapes=[pltpu.VMEM((tm, tn), jnp.float32)],
        compiler_params=pltpu.CompilerParams(
            dimension_semantics=("parallel", "parallel", "arbitrary"),
            vmem_limit_bytes=VMEM_LIMIT_BYTES,
        ),
    )(*operands)
    if Mp != M or Np != N:
        out = out[:M, :N]
    return out


def _flash_attn_kernel(q_ref, k_ref, v_ref, o_ref, m_sc, l_sc, acc_sc, *, tq, tk, start_pos):
    """Flash attention step for one (batch, head, q-tile, kv-tile).  Online softmax with f32
    m/l/acc scratch; Q is pre-scaled and RoPE'd; Q/K/V are bf16, scores/acc f32."""
    qi = pl.program_id(2)
    ki = pl.program_id(3)

    @pl.when(ki == 0)
    def _():
        m_sc[...] = jnp.full_like(m_sc, -jnp.inf)
        l_sc[...] = jnp.zeros_like(l_sc)
        acc_sc[...] = jnp.zeros_like(acc_sc)

    # Skip KV tiles that are entirely above the causal boundary for this q tile.
    @pl.when(ki * tk <= qi * tq + (tq - 1) + start_pos)
    def _():
        s = jnp.dot(q_ref[...], k_ref[...].T, preferred_element_type=jnp.float32)  # (tq, tk)
        row = lax.broadcasted_iota(jnp.int32, (tq, tk), 0) + qi * tq
        col = lax.broadcasted_iota(jnp.int32, (tq, tk), 1) + ki * tk
        # matches torch.triu(full(-inf), diagonal=start_pos + 1)
        s = jnp.where(col > row + start_pos, -jnp.inf, s)

        m_prev = m_sc[...]
        m_new = jnp.maximum(m_prev, jnp.max(s, axis=-1, keepdims=True))
        alpha = jnp.exp(m_prev - m_new)
        p = jnp.exp(s - m_new)
        l_sc[...] = alpha * l_sc[...] + jnp.sum(p, axis=-1, keepdims=True)
        acc_sc[...] = alpha * acc_sc[...] + jnp.dot(
            p.astype(jnp.bfloat16), v_ref[...], preferred_element_type=jnp.float32)
        m_sc[...] = m_new

    @pl.when(ki == pl.num_programs(3) - 1)
    def _():
        o_ref[...] = (acc_sc[...] / l_sc[...]).astype(o_ref.dtype)


def flash_attention(q, k, v, *, start_pos):
    """q: (B, n_head, S, hd) bf16 (RoPE + 1/sqrt(hd) folded); k/v: (B, S, hd) bf16 (MQA).
    Returns (B, n_head, S, hd) bf16."""
    B, nh, S, hd = q.shape
    tq = _pick_divisor_tile(S, 256, 8)
    tk = _pick_divisor_tile(S, 512, 128)
    grid = (B, nh, S // tq, S // tk)
    return pl.pallas_call(
        partial(_flash_attn_kernel, tq=tq, tk=tk, start_pos=start_pos),
        out_shape=jax.ShapeDtypeStruct((B, nh, S, hd), q.dtype),
        grid=grid,
        in_specs=[
            pl.BlockSpec((None, None, tq, hd), lambda b, h, qi, ki: (b, h, qi, 0)),
            pl.BlockSpec((None, tk, hd), lambda b, h, qi, ki: (b, ki, 0)),
            pl.BlockSpec((None, tk, hd), lambda b, h, qi, ki: (b, ki, 0)),
        ],
        out_specs=pl.BlockSpec((None, None, tq, hd), lambda b, h, qi, ki: (b, h, qi, 0)),
        scratch_shapes=[
            pltpu.VMEM((tq, 1), jnp.float32),    # running max
            pltpu.VMEM((tq, 1), jnp.float32),    # running denom
            pltpu.VMEM((tq, hd), jnp.float32),   # running numerator
        ],
        compiler_params=pltpu.CompilerParams(
            dimension_semantics=("parallel", "parallel", "parallel", "arbitrary"),
            vmem_limit_bytes=VMEM_LIMIT_BYTES,
        ),
    )(q, k, v)


# ----------------------------- model glue (plain JAX) ------------------------


def rope_cos_sin(seq_len, head_dim, base=10000.0):
    # Matches RotaryEmbedding.cos_sin for positions 0..seq_len-1 (reference prefill path).
    inv_freq = 1.0 / (base ** (jnp.arange(0, head_dim, 2, dtype=jnp.float32) / head_dim))
    t = jnp.arange(seq_len, dtype=jnp.float32)
    freqs = jnp.outer(t, inv_freq)
    emb = jnp.concatenate([freqs, freqs], axis=-1)   # (S, hd)
    return jnp.cos(emb), jnp.sin(emb)


def _rotate_half(x):
    half = x.shape[-1] // 2
    return jnp.concatenate([-x[..., half:], x[..., :half]], axis=-1)


def split_rope_heads(qkv, cos, sin, *, n_head, head_dim):
    """Split the packed QKV (B, S, (nh+2)*hd) bf16 into RoPE'd/scaled Q (B, nh, S, hd),
    RoPE'd K (B, S, hd) and V (B, S, hd) -- all bf16 (MQA: one shared KV head)."""
    B, S, _ = qkv.shape
    hd = head_dim
    qkv4 = qkv.reshape(B, S, n_head + 2, hd)
    xq = qkv4[:, :, :n_head, :].astype(jnp.float32)            # (B, S, nh, hd)
    xk = qkv4[:, :, n_head, :].astype(jnp.float32)             # (B, S, hd)
    xv = qkv4[:, :, n_head + 1, :]                             # (B, S, hd) bf16

    scale = 1.0 / math.sqrt(hd)                                # folded into Q once
    q_rot = (xq * cos[None, :, None, :] + _rotate_half(xq) * sin[None, :, None, :]) * scale
    k_rot = xk * cos[None, :, :] + _rotate_half(xk) * sin[None, :, :]

    q_rot = q_rot.transpose(0, 2, 1, 3).astype(jnp.bfloat16)   # (B, nh, S, hd)
    return q_rot, k_rot.astype(jnp.bfloat16), xv


def init_model(key, cfg: FalconConfig):
    H = cfg.hidden_size
    hd = H // cfg.n_head
    nq = (cfg.n_head + 2) * hd
    nq_pad = _round_up(nq, 128)
    keys = iter(jax.random.split(key, 2 + 4 * cfg.n_layer))

    def w(k, shape):
        return (0.02 * jax.random.normal(k, shape, dtype=jnp.float32)).astype(jnp.bfloat16)

    params = {
        "emb": 0.02 * jax.random.normal(next(keys), (cfg.vocab_size, H), dtype=jnp.float32),
        "lm_head": w(next(keys), (H, cfg.vocab_size)),
        "ln_f_w": jnp.ones((H,), jnp.float32),
        "ln_f_b": jnp.zeros((H,), jnp.float32),
        "layers": [],
    }
    for _ in range(cfg.n_layer):
        qkv_w = w(next(keys), (H, nq))
        h4h_w = w(next(keys), (H, 4 * H))
        # QKV and h_to_4h share the same LayerNorm input (Falcon parallel block) ->
        # concatenate along N so one fused LN-matmul produces both (QKV N padded to 128).
        qkv_4h_w = jnp.concatenate(
            [jnp.pad(qkv_w, ((0, 0), (0, nq_pad - nq))), h4h_w], axis=1)
        params["layers"].append({
            "ln_w": jnp.ones((H,), jnp.float32),
            "ln_b": jnp.zeros((H,), jnp.float32),
            "qkv_4h_w": qkv_4h_w,                        # (H, nq_pad + 4H) bf16
            "dense_w": w(next(keys), (cfg.n_head * hd, H)),
            "four_h_to_h_w": w(next(keys), (4 * H, H)),
        })
    return params


def transformer_block(x, lp, cos, sin, start_pos, cfg: FalconConfig):
    B, S, H = x.shape
    hd = H // cfg.n_head
    nq = (cfg.n_head + 2) * hd
    nq_pad = _round_up(nq, 128)
    x2d = x.reshape(B * S, H)

    # One fused kernel: LayerNorm(x) @ [W_qkv | W_h_to_4h], GELU on the MLP columns only.
    fused = ln_linear(x2d, lp["ln_w"], lp["ln_b"], lp["qkv_4h_w"],
                      eps=cfg.layer_norm_epsilon, gelu_from=nq_pad,
                      out_dtype=jnp.bfloat16)                  # (B*S, nq_pad + 4H)
    qkv = fused[:, :nq].reshape(B, S, nq)                      # (B, S, (nh+2)*hd) bf16
    m4h = fused[:, nq_pad:]                                    # (B*S, 4H) bf16, GELU applied

    q, k, v = split_rope_heads(qkv, cos, sin, n_head=cfg.n_head, head_dim=hd)
    attn = flash_attention(q, k, v, start_pos=start_pos)       # (B, nh, S, hd) bf16
    attn2d = attn.transpose(0, 2, 1, 3).reshape(B * S, cfg.n_head * hd)

    # dense projection with the attention-branch residual fused into the epilogue
    h_attn = linear(attn2d, lp["dense_w"], residual=x2d, out_dtype=jnp.float32)
    # MLP down-projection with the h_attn residual fused into the epilogue
    out = linear(m4h, lp["four_h_to_h_w"], residual=h_attn, out_dtype=jnp.float32)
    return out.reshape(B, S, H)


def falcon_forward(params, tokens, start_pos, cfg: FalconConfig):
    B, S = tokens.shape
    H = cfg.hidden_size
    hd = H // cfg.n_head

    h = params["emb"][tokens]                                  # (B, S, H) embedding gather
    cos, sin = rope_cos_sin(S, hd, base=cfg.rope_theta)

    for lp in params["layers"]:
        h = transformer_block(h, lp, cos, sin, start_pos, cfg)

    # final LayerNorm fused into the lm_head matmul; logits in f32 (`output.float()`)
    logits = ln_linear(h.reshape(B * S, H), params["ln_f_w"], params["ln_f_b"],
                       params["lm_head"], eps=cfg.layer_norm_epsilon,
                       out_dtype=jnp.float32)
    return logits.reshape(B, S, cfg.vocab_size)


# ----------------------------- main ------------------------------------------


if __name__ == "__main__":
    cfg = FalconConfig(vocab_size=128, hidden_size=64, n_head=4, n_layer=2)

    key = jax.random.PRNGKey(0)
    k_params, k_tok = jax.random.split(key)
    params = init_model(k_params, cfg)

    batch, seqlen = 2, 8
    tokens = jax.random.randint(k_tok, (batch, seqlen), 0, cfg.vocab_size, dtype=jnp.int32)

    fwd = jax.jit(lambda p, t: falcon_forward(p, t, start_pos=0, cfg=cfg))
    out = fwd(params, tokens)
    out = jax.block_until_ready(out)
    assert out.shape == (batch, seqlen, cfg.vocab_size)
    assert out.dtype == jnp.float32
    assert bool(jnp.all(jnp.isfinite(out)))
    print("KERNEL_OK")
</pallas_src>

<mosaic_0001>
module attributes {stable_mosaic.version = 11 : i64} {
  func.func @_ln_matmul_kernel(%arg0: i32, %arg1: i32, %arg2: memref<16x64xf32, #tpu.memory_space<vmem>>, %arg3: memref<1x64xf32, #tpu.memory_space<vmem>>, %arg4: memref<1x64xf32, #tpu.memory_space<vmem>>, %arg5: memref<64x384xbf16, #tpu.memory_space<vmem>>, %arg6: memref<16x384xbf16, #tpu.memory_space<vmem>>, %arg7: memref<16x64xbf16, #tpu.memory_space<vmem>>) attributes {dimension_semantics = [#tpu.dimension_semantics<parallel>, #tpu.dimension_semantics<arbitrary>], iteration_bounds = array<i64: 1, 1>, scalar_prefetch = 0 : i64, scratch_operands = 1 : i64, tpu.core_type = #tpu.core_type<tc>, window_params = [{transform_indices = @transform_0, window_bounds = array<i64: 16, 64>}, {pipeline_mode = #tpu.pipeline_mode<synchronous>, transform_indices = @transform_1, window_bounds = array<i64: 1, 64>}, {pipeline_mode = #tpu.pipeline_mode<synchronous>, transform_indices = @transform_2, window_bounds = array<i64: 1, 64>}, {transform_indices = @transform_3, window_bounds = array<i64: 64, 384>}, {transform_indices = @transform_4, window_bounds = array<i64: 16, 384>}]} {
    %c0_i32 = arith.constant 0 : i32
    %0 = arith.cmpi eq, %arg1, %c0_i32 : i32
    %1 = arith.extui %0 : i1 to i32
    %c0_i32_0 = arith.constant 0 : i32
    %2 = arith.cmpi ne, %1, %c0_i32_0 : i32
    scf.if %2 {
      %c0_9 = arith.constant 0 : index
      %c0_10 = arith.constant 0 : index
      %23 = vector.load %arg2[%c0_9, %c0_10] : memref<16x64xf32, #tpu.memory_space<vmem>>, vector<16x64xf32>
      %cst_11 = arith.constant dense<0.000000e+00> : vector<16xf32>
      %24 = vector.multi_reduction <add>, %23, %cst_11 [1] : vector<16x64xf32> to vector<16xf32>
      %25 = vector.shape_cast %24 : vector<16xf32> to vector<16x1xf32>
      %cst_12 = arith.constant 6.400000e+01 : f32
      %26 = vector.broadcast %cst_12 : f32 to vector<16x1xf32>
      %27 = arith.divf %25, %26 : vector<16x1xf32>
      %28 = vector.broadcast %27 : vector<16x1xf32> to vector<16x64xf32>
      %29 = arith.subf %23, %28 : vector<16x64xf32>
      %30 = arith.mulf %29, %29 : vector<16x64xf32>
      %cst_13 = arith.constant dense<0.000000e+00> : vector<16xf32>
      %31 = vector.multi_reduction <add>, %30, %cst_13 [1] : vector<16x64xf32> to vector<16xf32>
      %32 = vector.shape_cast %31 : vector<16xf32> to vector<16x1xf32>
      %cst_14 = arith.constant 6.400000e+01 : f32
      %33 = vector.broadcast %cst_14 : f32 to vector<16x1xf32>
      %34 = arith.divf %32, %33 : vector<16x1xf32>
      %cst_15 = arith.constant 9.99999974E-6 : f32
      %35 = vector.broadcast %cst_15 : f32 to vector<16x1xf32>
      %36 = arith.addf %34, %35 : vector<16x1xf32>
      %37 = math.rsqrt %36 : vector<16x1xf32>
      %38 = vector.broadcast %37 : vector<16x1xf32> to vector<16x64xf32>
      %39 = arith.mulf %29, %38 : vector<16x64xf32>
      %c0_16 = arith.constant 0 : index
      %c0_17 = arith.constant 0 : index
      %40 = vector.load %arg3[%c0_16, %c0_17] : memref<1x64xf32, #tpu.memory_space<vmem>>, vector<1x64xf32>
      %41 = vector.broadcast %40 : vector<1x64xf32> to vector<16x64xf32>
      %42 = arith.mulf %39, %41 : vector<16x64xf32>
      %c0_18 = arith.constant 0 : index
      %c0_19 = arith.constant 0 : index
      %43 = vector.load %arg4[%c0_18, %c0_19] : memref<1x64xf32, #tpu.memory_space<vmem>>, vector<1x64xf32>
      %44 = vector.broadcast %43 : vector<1x64xf32> to vector<16x64xf32>
      %45 = arith.addf %42, %44 : vector<16x64xf32>
      %46 = arith.truncf %45 : vector<16x64xf32> to vector<16x64xbf16>
      %c0_20 = arith.constant 0 : index
      %c0_21 = arith.constant 0 : index
      %47 = vector.load %arg7[%c0_20, %c0_21] : memref<16x64xbf16, #tpu.memory_space<vmem>>, vector<16x64xbf16>
      tpu.vector_store %arg7[%c0_20, %c0_21], %46 {strides = array<i32>} : memref<16x64xbf16, #tpu.memory_space<vmem>>, vector<16x64xbf16>,
    } else {
    }
    %c0 = arith.constant 0 : index
    %c0_1 = arith.constant 0 : index
    %3 = vector.load %arg7[%c0, %c0_1] : memref<16x64xbf16, #tpu.memory_space<vmem>>, vector<16x64xbf16>
    %c0_2 = arith.constant 0 : index
    %c0_3 = arith.constant 0 : index
    %4 = vector.load %arg5[%c0_2, %c0_3] : memref<64x384xbf16, #tpu.memory_space<vmem>>, vector<64x384xbf16>
    %cst = arith.constant dense<0.000000e+00> : vector<16x384xf32>
    %5 = tpu.matmul %3, %4, %cst {dimension_numbers = #tpu.dot_dimension_numbers<[1], [0], [0], [1], [0, 0, 1, 1], [], []>} : vector<16x64xbf16>, vector<64x384xbf16>, vector<16x384xf32> -> vector<16x384xf32>
    %6 = tpu.iota {dimensions = array<i32: 1>} : vector<16x384xi32>
    %c384_i32 = arith.constant 384 : i32
    %7 = arith.muli %arg1, %c384_i32 : i32
    %8 = vector.broadcast %7 : i32 to vector<16x384xi32>
    %9 = arith.addi %6, %8 : vector<16x384xi32>
    %c128_i32 = arith.constant 128 : i32
    %10 = vector.broadcast %c128_i32 : i32 to vector<16x384xi32>
    %11 = arith.cmpi sge, %9, %10 : vector<16x384xi32>
    %cst_4 = arith.constant 5.000000e-01 : f32
    %12 = vector.broadcast %cst_4 : f32 to vector<16x384xf32>
    %13 = arith.mulf %12, %5 : vector<16x384xf32>
    %cst_5 = arith.constant 0.707106769 : f32
    %14 = vector.broadcast %cst_5 : f32 to vector<16x384xf32>
    %15 = arith.mulf %5, %14 : vector<16x384xf32>
    %16 = math.erf %15 : vector<16x384xf32>
    %cst_6 = arith.constant 1.000000e+00 : f32
    %17 = vector.broadcast %cst_6 : f32 to vector<16x384xf32>
    %18 = arith.addf %17, %16 : vector<16x384xf32>
    %19 = arith.mulf %13, %18 : vector<16x384xf32>
    %20 = arith.select %11, %19, %5 : vector<16x384xi1>, vector<16x384xf32>
    %21 = arith.truncf %20 : vector<16x384xf32> to vector<16x384xbf16>
    %c0_7 = arith.constant 0 : index
    %c0_8 = arith.constant 0 : index
    %22 = vector.load %arg6[%c0_7, %c0_8] : memref<16x384xbf16, #tpu.memory_space<vmem>>, vector<16x384xbf16>
    tpu.vector_store %arg6[%c0_7, %c0_8], %21 {strides = array<i32>} : memref<16x384xbf16, #tpu.memory_space<vmem>>, vector<16x384xbf16>,
    return
  }
  func.func @transform_0(%arg0: i32, %arg1: i32) -> (i32, i32) {
    %c0_i32 = arith.constant 0 : i32
    %c0_i32_0 = arith.constant 0 : i32
    return %arg0, %c0_i32 : i32, i32
  }
  func.func @transform_1(%arg0: i32, %arg1: i32) -> (i32, i32) {
    %c0_i32 = arith.constant 0 : i32
    %c0_i32_0 = arith.constant 0 : i32
    %c0_i32_1 = arith.constant 0 : i32
    return %c0_i32, %c0_i32_0 : i32, i32
  }
  func.func @transform_2(%arg0: i32, %arg1: i32) -> (i32, i32) {
    %c0_i32 = arith.constant 0 : i32
    %c0_i32_0 = arith.constant 0 : i32
    %c0_i32_1 = arith.constant 0 : i32
    return %c0_i32, %c0_i32_0 : i32, i32
  }
  func.func @transform_3(%arg0: i32, %arg1: i32) -> (i32, i32) {
    %c0_i32 = arith.constant 0 : i32
    %c0_i32_0 = arith.constant 0 : i32
    return %c0_i32, %arg1 : i32, i32
  }
  func.func @transform_4(%arg0: i32, %arg1: i32) -> (i32, i32) {
    %c0_i32 = arith.constant 0 : i32
    return %arg0, %arg1 : i32, i32
  }
}

module attributes {stable_mosaic.version = 11 : i64} {
  func.func @_flash_attn_kernel(%arg0: i32, %arg1: i32, %arg2: i32, %arg3: i32, %arg4: memref<1x1x8x16xbf16, #tpu.memory_space<vmem>>, %arg5: memref<1x8x16xbf16, #tpu.memory_space<vmem>>, %arg6: memref<1x8x16xbf16, #tpu.memory_space<vmem>>, %arg7: memref<1x1x8x16xbf16, #tpu.memory_space<vmem>>, %arg8: memref<8x1xf32, #tpu.memory_space<vmem>>, %arg9: memref<8x1xf32, #tpu.memory_space<vmem>>, %arg10: memref<8x16xf32, #tpu.memory_space<vmem>>) attributes {dimension_semantics = [#tpu.dimension_semantics<parallel>, #tpu.dimension_semantics<parallel>, #tpu.dimension_semantics<parallel>, #tpu.dimension_semantics<arbitrary>], iteration_bounds = array<i64: 2, 4, 1, 1>, scalar_prefetch = 0 : i64, scratch_operands = 3 : i64, tpu.core_type = #tpu.core_type<tc>, window_params = [{transform_indices = @transform_0, window_bounds = array<i64: 1, 1, 8, 16>}, {transform_indices = @transform_1, window_bounds = array<i64: 1, 8, 16>}, {transform_indices = @transform_2, window_bounds = array<i64: 1, 8, 16>}, {transform_indices = @transform_3, window_bounds = array<i64: 1, 1, 8, 16>}]} {
    %c0_i32 = arith.constant 0 : i32
    %0 = arith.cmpi eq, %arg3, %c0_i32 : i32
    %1 = arith.extui %0 : i1 to i32
    %c0_i32_0 = arith.constant 0 : i32
    %2 = arith.cmpi ne, %1, %c0_i32_0 : i32
    scf.if %2 {
      %cst = arith.constant 0xFF800000 : f32
      %13 = vector.broadcast %cst : f32 to vector<8x1xf32>
      %c0 = arith.constant 0 : index
      %c0_6 = arith.constant 0 : index
      %14 = vector.load %arg8[%c0, %c0_6] : memref<8x1xf32, #tpu.memory_space<vmem>>, vector<8x1xf32>
      tpu.vector_store %arg8[%c0, %c0_6], %13 {strides = array<i32>} : memref<8x1xf32, #tpu.memory_space<vmem>>, vector<8x1xf32>,
      %cst_7 = arith.constant 0.000000e+00 : f32
      %15 = vector.broadcast %cst_7 : f32 to vector<8x1xf32>
      %c0_8 = arith.constant 0 : index
      %c0_9 = arith.constant 0 : index
      %16 = vector.load %arg9[%c0_8, %c0_9] : memref<8x1xf32, #tpu.memory_space<vmem>>, vector<8x1xf32>
      tpu.vector_store %arg9[%c0_8, %c0_9], %15 {strides = array<i32>} : memref<8x1xf32, #tpu.memory_space<vmem>>, vector<8x1xf32>,
      %cst_10 = arith.constant 0.000000e+00 : f32
      %17 = vector.broadcast %cst_10 : f32 to vector<8x16xf32>
      %c0_11 = arith.constant 0 : index
      %c0_12 = arith.constant 0 : index
      %18 = vector.load %arg10[%c0_11, %c0_12] : memref<8x16xf32, #tpu.memory_space<vmem>>, vector<8x16xf32>
      tpu.vector_store %arg10[%c0_11, %c0_12], %17 {strides = array<i32>} : memref<8x16xf32, #tpu.memory_space<vmem>>, vector<8x16xf32>,
    } else {
    }
    %c8_i32 = arith.constant 8 : i32
    %3 = arith.muli %arg3, %c8_i32 : i32
    %c8_i32_1 = arith.constant 8 : i32
    %4 = arith.muli %arg2, %c8_i32_1 : i32
    %c7_i32 = arith.constant 7 : i32
    %5 = arith.addi %4, %c7_i32 : i32
    %c0_i32_2 = arith.constant 0 : i32
    %6 = arith.addi %5, %c0_i32_2 : i32
    %7 = arith.cmpi sle, %3, %6 : i32
    %8 = arith.extui %7 : i1 to i32
    %c0_i32_3 = arith.constant 0 : i32
    %9 = arith.cmpi ne, %8, %c0_i32_3 : i32
    scf.if %9 {
      %c0 = arith.constant 0 : index
      %c0_6 = arith.constant 0 : index
      %c0_7 = arith.constant 0 : index
      %c0_8 = arith.constant 0 : index
      %13 = vector.load %arg4[%c0, %c0_6, %c0_7, %c0_8] : memref<1x1x8x16xbf16, #tpu.memory_space<vmem>>, vector<1x1x8x16xbf16>
      %14 = vector.shape_cast %13 : vector<1x1x8x16xbf16> to vector<8x16xbf16>
      %c0_9 = arith.constant 0 : index
      %c0_10 = arith.constant 0 : index
      %c0_11 = arith.constant 0 : index
      %15 = vector.load %arg5[%c0_9, %c0_10, %c0_11] : memref<1x8x16xbf16, #tpu.memory_space<vmem>>, vector<1x8x16xbf16>
      %16 = vector.shape_cast %15 : vector<1x8x16xbf16> to vector<8x16xbf16>
      %17 = tpu.transpose %16, [1, 0] : vector<8x16xbf16> -> vector<16x8xbf16>
      %cst = arith.constant dense<0.000000e+00> : vector<8x8xf32>
      %18 = tpu.matmul %14, %17, %cst {dimension_numbers = #tpu.dot_dimension_numbers<[1], [0], [0], [1], [0, 0, 1, 1], [], []>} : vector<8x16xbf16>, vector<16x8xbf16>, vector<8x8xf32> -> vector<8x8xf32>
      %19 = tpu.iota {dimensions = array<i32: 0>} : vector<8x8xi32>
      %c8_i32_12 = arith.constant 8 : i32
      %20 = arith.muli %arg2, %c8_i32_12 : i32
      %21 = vector.broadcast %20 : i32 to vector<8x8xi32>
      %22 = arith.addi %19, %21 : vector<8x8xi32>
      %23 = tpu.iota {dimensions = array<i32: 1>} : vector<8x8xi32>
      %c8_i32_13 = arith.constant 8 : i32
      %24 = arith.muli %arg3, %c8_i32_13 : i32
      %25 = vector.broadcast %24 : i32 to vector<8x8xi32>
      %26 = arith.addi %23, %25 : vector<8x8xi32>
      %c0_i32_14 = arith.constant 0 : i32
      %27 = vector.broadcast %c0_i32_14 : i32 to vector<8x8xi32>
      %28 = arith.addi %22, %27 : vector<8x8xi32>
      %29 = arith.cmpi sgt, %26, %28 : vector<8x8xi32>
      %cst_15 = arith.constant 0xFF800000 : f32
      %30 = vector.broadcast %cst_15 : f32 to vector<8x8xf32>
      %31 = arith.select %29, %30, %18 : vector<8x8xi1>, vector<8x8xf32>
      %c0_16 = arith.constant 0 : index
      %c0_17 = arith.constant 0 : index
      %32 = vector.load %arg8[%c0_16, %c0_17] : memref<8x1xf32, #tpu.memory_space<vmem>>, vector<8x1xf32>
      %cst_18 = arith.constant dense<0xFF800000> : vector<8xf32>
      %33 = vector.multi_reduction <maximumf>, %31, %cst_18 [1] : vector<8x8xf32> to vector<8xf32>
      %34 = vector.shape_cast %33 : vector<8xf32> to vector<8x1xf32>
      %35 = arith.maximumf %32, %34 : vector<8x1xf32>
      %36 = arith.subf %32, %35 : vector<8x1xf32>
      %37 = math.exp %36 : vector<8x1xf32>
      %38 = vector.broadcast %35 : vector<8x1xf32> to vector<8x8xf32>
      %39 = arith.subf %31, %38 : vector<8x8xf32>
      %40 = math.exp %39 : vector<8x8xf32>
      %c0_19 = arith.constant 0 : index
      %c0_20 = arith.constant 0 : index
      %41 = vector.load %arg9[%c0_19, %c0_20] : memref<8x1xf32, #tpu.memory_space<vmem>>, vector<8x1xf32>
      %42 = arith.mulf %37, %41 : vector<8x1xf32>
      %cst_21 = arith.constant dense<0.000000e+00> : vector<8xf32>
      %43 = vector.multi_reduction <add>, %40, %cst_21 [1] : vector<8x8xf32> to vector<8xf32>
      %44 = vector.shape_cast %43 : vector<8xf32> to vector<8x1xf32>
      %45 = arith.addf %42, %44 : vector<8x1xf32>
      %c0_22 = arith.constant 0 : index
      %c0_23 = arith.constant 0 : index
      %46 = vector.load %arg9[%c0_22, %c0_23] : memref<8x1xf32, #tpu.memory_space<vmem>>, vector<8x1xf32>
      tpu.vector_store %arg9[%c0_22, %c0_23], %45 {strides = array<i32>} : memref<8x1xf32, #tpu.memory_space<vmem>>, vector<8x1xf32>,
      %c0_24 = arith.constant 0 : index
      %c0_25 = arith.constant 0 : index
      %47 = vector.load %arg10[%c0_24, %c0_25] : memref<8x16xf32, #tpu.memory_space<vmem>>, vector<8x16xf32>
      %48 = vector.broadcast %37 : vector<8x1xf32> to vector<8x16xf32>
      %49 = arith.mulf %48, %47 : vector<8x16xf32>
      %50 = arith.truncf %40 : vector<8x8xf32> to vector<8x8xbf16>
      %c0_26 = arith.constant 0 : index
      %c0_27 = arith.constant 0 : index
      %c0_28 = arith.constant 0 : index
      %51 = vector.load %arg6[%c0_26, %c0_27, %c0_28] : memref<1x8x16xbf16, #tpu.memory_space<vmem>>, vector<1x8x16xbf16>
      %52 = vector.shape_cast %51 : vector<1x8x16xbf16> to vector<8x16xbf16>
      %cst_29 = arith.constant dense<0.000000e+00> : vector<8x16xf32>
      %53 = tpu.matmul %50, %52, %cst_29 {dimension_numbers = #tpu.dot_dimension_numbers<[1], [0], [0], [1], [0, 0, 1, 1], [], []>} : vector<8x8xbf16>, vector<8x16xbf16>, vector<8x16xf32> -> vector<8x16xf32>
      %54 = arith.addf %49, %53 : vector<8x16xf32>
      %c0_30 = arith.constant 0 : index
      %c0_31 = arith.constant 0 : index
      %55 = vector.load %arg10[%c0_30, %c0_31] : memref<8x16xf32, #tpu.memory_space<vmem>>, vector<8x16xf32>
      tpu.vector_store %arg10[%c0_30, %c0_31], %54 {strides = array<i32>} : memref<8x16xf32, #tpu.memory_space<vmem>>, vector<8x16xf32>,
      %c0_32 = arith.constant 0 : index
      %c0_33 = arith.constant 0 : index
      %56 = vector.load %arg8[%c0_32, %c0_33] : memref<8x1xf32, #tpu.memory_space<vmem>>, vector<8x1xf32>
      tpu.vector_store %arg8[%c0_32, %c0_33], %35 {strides = array<i32>} : memref<8x1xf32, #tpu.memory_space<vmem>>, vector<8x1xf32>,
    } else {
    }
    %c0_i32_4 = arith.constant 0 : i32
    %10 = arith.cmpi eq, %arg3, %c0_i32_4 : i32
    %11 = arith.extui %10 : i1 to i32
    %c0_i32_5 = arith.constant 0 : i32
    %12 = arith.cmpi ne, %11, %c0_i32_5 : i32
    scf.if %12 {
      %c0 = arith.constant 0 : index
      %c0_6 = arith.constant 0 : index
      %13 = vector.load %arg10[%c0, %c0_6] : memref<8x16xf32, #tpu.memory_space<vmem>>, vector<8x16xf32>
      %c0_7 = arith.constant 0 : index
      %c0_8 = arith.constant 0 : index
      %14 = vector.load %arg9[%c0_7, %c0_8] : memref<8x1xf32, #tpu.memory_space<vmem>>, vector<8x1xf32>
      %15 = vector.broadcast %14 : vector<8x1xf32> to vector<8x16xf32>
      %16 = arith.divf %13, %15 : vector<8x16xf32>
      %17 = arith.truncf %16 : vector<8x16xf32> to vector<8x16xbf16>
      %c0_9 = arith.constant 0 : index
      %c0_10 = arith.constant 0 : index
      %c0_11 = arith.constant 0 : index
      %c0_12 = arith.constant 0 : index
      %18 = vector.load %arg7[%c0_9, %c0_10, %c0_11, %c0_12] : memref<1x1x8x16xbf16, #tpu.memory_space<vmem>>, vector<1x1x8x16xbf16>
      %19 = vector.shape_cast %18 : vector<1x1x8x16xbf16> to vector<8x16xbf16>
      %20 = vector.shape_cast %17 : vector<8x16xbf16> to vector<1x1x8x16xbf16>
      tpu.vector_store %arg7[%c0_9, %c0_10, %c0_11, %c0_12], %20 {strides = array<i32>} : memref<1x1x8x16xbf16, #tpu.memory_space<vmem>>, vector<1x1x8x16xbf16>,
    } else {
    }
    return
  }
  func.func @transform_0(%arg0: i32, %arg1: i32, %arg2: i32, %arg3: i32) -> (i32, i32, i32, i32) {
    %c0_i32 = arith.constant 0 : i32
    %c0_i32_0 = arith.constant 0 : i32
    return %arg0, %arg1, %arg2, %c0_i32 : i32, i32, i32, i32
  }
  func.func @transform_1(%arg0: i32, %arg1: i32, %arg2: i32, %arg3: i32) -> (i32, i32, i32) {
    %c0_i32 = arith.constant 0 : i32
    %c0_i32_0 = arith.constant 0 : i32
    return %arg0, %arg3, %c0_i32 : i32, i32, i32
  }
  func.func @transform_2(%arg0: i32, %arg1: i32, %arg2: i32, %arg3: i32) -> (i32, i32, i32) {
    %c0_i32 = arith.constant 0 : i32
    %c0_i32_0 = arith.constant 0 : i32
    return %arg0, %arg3, %c0_i32 : i32, i32, i32
  }
  func.func @transform_3(%arg0: i32, %arg1: i32, %arg2: i32, %arg3: i32) -> (i32, i32, i32, i32) {
    %c0_i32 = arith.constant 0 : i32
    %c0_i32_0 = arith.constant 0 : i32
    return %arg0, %arg1, %arg2, %c0_i32 : i32, i32, i32, i32
  }
}

module attributes {stable_mosaic.version = 11 : i64} {
  func.func @_matmul_res_kernel(%arg0: i32, %arg1: i32, %arg2: i32, %arg3: memref<16x64xbf16, #tpu.memory_space<vmem>>, %arg4: memref<64x64xbf16, #tpu.memory_space<vmem>>, %arg5: memref<16x64xf32, #tpu.memory_space<vmem>>, %arg6: memref<16x64xf32, #tpu.memory_space<vmem>>, %arg7: memref<16x64xf32, #tpu.memory_space<vmem>>) attributes {dimension_semantics = [#tpu.dimension_semantics<parallel>, #tpu.dimension_semantics<parallel>, #tpu.dimension_semantics<arbitrary>], iteration_bounds = array<i64: 1, 1, 1>, scalar_prefetch = 0 : i64, scratch_operands = 1 : i64, tpu.core_type = #tpu.core_type<tc>, window_params = [{transform_indices = @transform_0, window_bounds = array<i64: 16, 64>}, {transform_indices = @transform_1, window_bounds = array<i64: 64, 64>}, {transform_indices = @transform_2, window_bounds = array<i64: 16, 64>}, {transform_indices = @transform_3, window_bounds = array<i64: 16, 64>}]} {
    %c0_i32 = arith.constant 0 : i32
    %0 = arith.cmpi eq, %arg2, %c0_i32 : i32
    %1 = arith.extui %0 : i1 to i32
    %c0_i32_0 = arith.constant 0 : i32
    %2 = arith.cmpi ne, %1, %c0_i32_0 : i32
    scf.if %2 {
      %cst_10 = arith.constant 0.000000e+00 : f32
      %12 = vector.broadcast %cst_10 : f32 to vector<16x64xf32>
      %c0_11 = arith.constant 0 : index
      %c0_12 = arith.constant 0 : index
      %13 = vector.load %arg7[%c0_11, %c0_12] : memref<16x64xf32, #tpu.memory_space<vmem>>, vector<16x64xf32>
      tpu.vector_store %arg7[%c0_11, %c0_12], %12 {strides = array<i32>} : memref<16x64xf32, #tpu.memory_space<vmem>>, vector<16x64xf32>,
    } else {
    }
    %c0 = arith.constant 0 : index
    %c0_1 = arith.constant 0 : index
    %3 = vector.load %arg7[%c0, %c0_1] : memref<16x64xf32, #tpu.memory_space<vmem>>, vector<16x64xf32>
    %c0_2 = arith.constant 0 : index
    %c0_3 = arith.constant 0 : index
    %4 = vector.load %arg3[%c0_2, %c0_3] : memref<16x64xbf16, #tpu.memory_space<vmem>>, vector<16x64xbf16>
    %c0_4 = arith.constant 0 : index
    %c0_5 = arith.constant 0 : index
    %5 = vector.load %arg4[%c0_4, %c0_5] : memref<64x64xbf16, #tpu.memory_space<vmem>>, vector<64x64xbf16>
    %cst = arith.constant dense<0.000000e+00> : vector<16x64xf32>
    %6 = tpu.matmul %4, %5, %cst {dimension_numbers = #tpu.dot_dimension_numbers<[1], [0], [0], [1], [0, 0, 1, 1], [], []>} : vector<16x64xbf16>, vector<64x64xbf16>, vector<16x64xf32> -> vector<16x64xf32>
    %7 = arith.addf %3, %6 : vector<16x64xf32>
    %c0_6 = arith.constant 0 : index
    %c0_7 = arith.constant 0 : index
    %8 = vector.load %arg7[%c0_6, %c0_7] : memref<16x64xf32, #tpu.memory_space<vmem>>, vector<16x64xf32>
    tpu.vector_store %arg7[%c0_6, %c0_7], %7 {strides = array<i32>} : memref<16x64xf32, #tpu.memory_space<vmem>>, vector<16x64xf32>,
    %c0_i32_8 = arith.constant 0 : i32
    %9 = arith.cmpi eq, %arg2, %c0_i32_8 : i32
    %10 = arith.extui %9 : i1 to i32
    %c0_i32_9 = arith.constant 0 : i32
    %11 = arith.cmpi ne, %10, %c0_i32_9 : i32
    scf.if %11 {
      %c0_10 = arith.constant 0 : index
      %c0_11 = arith.constant 0 : index
      %12 = vector.load %arg7[%c0_10, %c0_11] : memref<16x64xf32, #tpu.memory_space<vmem>>, vector<16x64xf32>
      %c0_12 = arith.constant 0 : index
      %c0_13 = arith.constant 0 : index
      %13 = vector.load %arg5[%c0_12, %c0_13] : memref<16x64xf32, #tpu.memory_space<vmem>>, vector<16x64xf32>
      %14 = arith.addf %12, %13 : vector<16x64xf32>
      %c0_14 = arith.constant 0 : index
      %c0_15 = arith.constant 0 : index
      %15 = vector.load %arg6[%c0_14, %c0_15] : memref<16x64xf32, #tpu.memory_space<vmem>>, vector<16x64xf32>
      tpu.vector_store %arg6[%c0_14, %c0_15], %14 {strides = array<i32>} : memref<16x64xf32, #tpu.memory_space<vmem>>, vector<16x64xf32>,
    } else {
    }
    return
  }
  func.func @transform_0(%arg0: i32, %arg1: i32, %arg2: i32) -> (i32, i32) {
    %c0_i32 = arith.constant 0 : i32
    return %arg0, %arg2 : i32, i32
  }
  func.func @transform_1(%arg0: i32, %arg1: i32, %arg2: i32) -> (i32, i32) {
    %c0_i32 = arith.constant 0 : i32
    return %arg2, %arg1 : i32, i32
  }
  func.func @transform_2(%arg0: i32, %arg1: i32, %arg2: i32) -> (i32, i32) {
    %c0_i32 = arith.constant 0 : i32
    return %arg0, %arg1 : i32, i32
  }
  func.func @transform_3(%arg0: i32, %arg1: i32, %arg2: i32) -> (i32, i32) {
    %c0_i32 = arith.constant 0 : i32
    return %arg0, %arg1 : i32, i32
  }
}

module attributes {stable_mosaic.version = 11 : i64} {
  func.func @_matmul_res_kernel(%arg0: i32, %arg1: i32, %arg2: i32, %arg3: memref<16x256xbf16, #tpu.memory_space<vmem>>, %arg4: memref<256x64xbf16, #tpu.memory_space<vmem>>, %arg5: memref<16x64xf32, #tpu.memory_space<vmem>>, %arg6: memref<16x64xf32, #tpu.memory_space<vmem>>, %arg7: memref<16x64xf32, #tpu.memory_space<vmem>>) attributes {dimension_semantics = [#tpu.dimension_semantics<parallel>, #tpu.dimension_semantics<parallel>, #tpu.dimension_semantics<arbitrary>], iteration_bounds = array<i64: 1, 1, 1>, scalar_prefetch = 0 : i64, scratch_operands = 1 : i64, tpu.core_type = #tpu.core_type<tc>, window_params = [{transform_indices = @transform_0, window_bounds = array<i64: 16, 256>}, {transform_indices = @transform_1, window_bounds = array<i64: 256, 64>}, {transform_indices = @transform_2, window_bounds = array<i64: 16, 64>}, {transform_indices = @transform_3, window_bounds = array<i64: 16, 64>}]} {
    %c0_i32 = arith.constant 0 : i32
    %0 = arith.cmpi eq, %arg2, %c0_i32 : i32
    %1 = arith.extui %0 : i1 to i32
    %c0_i32_0 = arith.constant 0 : i32
    %2 = arith.cmpi ne, %1, %c0_i32_0 : i32
    scf.if %2 {
      %cst_10 = arith.constant 0.000000e+00 : f32
      %12 = vector.broadcast %cst_10 : f32 to vector<16x64xf32>
      %c0_11 = arith.constant 0 : index
      %c0_12 = arith.constant 0 : index
      %13 = vector.load %arg7[%c0_11, %c0_12] : memref<16x64xf32, #tpu.memory_space<vmem>>, vector<16x64xf32>
      tpu.vector_store %arg7[%c0_11, %c0_12], %12 {strides = array<i32>} : memref<16x64xf32, #tpu.memory_space<vmem>>, vector<16x64xf32>,
    } else {
    }
    %c0 = arith.constant 0 : index
    %c0_1 = arith.constant 0 : index
    %3 = vector.load %arg7[%c0, %c0_1] : memref<16x64xf32, #tpu.memory_space<vmem>>, vector<16x64xf32>
    %c0_2 = arith.constant 0 : index
    %c0_3 = arith.constant 0 : index
    %4 = vector.load %arg3[%c0_2, %c0_3] : memref<16x256xbf16, #tpu.memory_space<vmem>>, vector<16x256xbf16>
    %c0_4 = arith.constant 0 : index
    %c0_5 = arith.constant 0 : index
    %5 = vector.load %arg4[%c0_4, %c0_5] : memref<256x64xbf16, #tpu.memory_space<vmem>>, vector<256x64xbf16>
    %cst = arith.constant dense<0.000000e+00> : vector<16x64xf32>
    %6 = tpu.matmul %4, %5, %cst {dimension_numbers = #tpu.dot_dimension_numbers<[1], [0], [0], [1], [0, 0, 1, 1], [], []>} : vector<16x256xbf16>, vector<256x64xbf16>, vector<16x64xf32> -> vector<16x64xf32>
    %7 = arith.addf %3, %6 : vector<16x64xf32>
    %c0_6 = arith.constant 0 : index
    %c0_7 = arith.constant 0 : index
    %8 = vector.load %arg7[%c0_6, %c0_7] : memref<16x64xf32, #tpu.memory_space<vmem>>, vector<16x64xf32>
    tpu.vector_store %arg7[%c0_6, %c0_7], %7 {strides = array<i32>} : memref<16x64xf32, #tpu.memory_space<vmem>>, vector<16x64xf32>,
    %c0_i32_8 = arith.constant 0 : i32
    %9 = arith.cmpi eq, %arg2, %c0_i32_8 : i32
    %10 = arith.extui %9 : i1 to i32
    %c0_i32_9 = arith.constant 0 : i32
    %11 = arith.cmpi ne, %10, %c0_i32_9 : i32
    scf.if %11 {
      %c0_10 = arith.constant 0 : index
      %c0_11 = arith.constant 0 : index
      %12 = vector.load %arg7[%c0_10, %c0_11] : memref<16x64xf32, #tpu.memory_space<vmem>>, vector<16x64xf32>
      %c0_12 = arith.constant 0 : index
      %c0_13 = arith.constant 0 : index
      %13 = vector.load %arg5[%c0_12, %c0_13] : memref<16x64xf32, #tpu.memory_space<vmem>>, vector<16x64xf32>
      %14 = arith.addf %12, %13 : vector<16x64xf32>
      %c0_14 = arith.constant 0 : index
      %c0_15 = arith.constant 0 : index
      %15 = vector.load %arg6[%c0_14, %c0_15] : memref<16x64xf32, #tpu.memory_space<vmem>>, vector<16x64xf32>
      tpu.vector_store %arg6[%c0_14, %c0_15], %14 {strides = array<i32>} : memref<16x64xf32, #tpu.memory_space<vmem>>, vector<16x64xf32>,
    } else {
    }
    return
  }
  func.func @transform_0(%arg0: i32, %arg1: i32, %arg2: i32) -> (i32, i32) {
    %c0_i32 = arith.constant 0 : i32
    return %arg0, %arg2 : i32, i32
  }
  func.func @transform_1(%arg0: i32, %arg1: i32, %arg2: i32) -> (i32, i32) {
    %c0_i32 = arith.constant 0 : i32
    return %arg2, %arg1 : i32, i32
  }
  func.func @transform_2(%arg0: i32, %arg1: i32, %arg2: i32) -> (i32, i32) {
    %c0_i32 = arith.constant 0 : i32
    return %arg0, %arg1 : i32, i32
  }
  func.func @transform_3(%arg0: i32, %arg1: i32, %arg2: i32) -> (i32, i32) {
    %c0_i32 = arith.constant 0 : i32
    return %arg0, %arg1 : i32, i32
  }
}

module attributes {stable_mosaic.version = 11 : i64} {
  func.func @_ln_matmul_kernel(%arg0: i32, %arg1: i32, %arg2: memref<16x64xf32, #tpu.memory_space<vmem>>, %arg3: memref<1x64xf32, #tpu.memory_space<vmem>>, %arg4: memref<1x64xf32, #tpu.memory_space<vmem>>, %arg5: memref<64x128xbf16, #tpu.memory_space<vmem>>, %arg6: memref<16x128xf32, #tpu.memory_space<vmem>>, %arg7: memref<16x64xbf16, #tpu.memory_space<vmem>>) attributes {dimension_semantics = [#tpu.dimension_semantics<parallel>, #tpu.dimension_semantics<arbitrary>], iteration_bounds = array<i64: 1, 1>, scalar_prefetch = 0 : i64, scratch_operands = 1 : i64, tpu.core_type = #tpu.core_type<tc>, window_params = [{transform_indices = @transform_0, window_bounds = array<i64: 16, 64>}, {pipeline_mode = #tpu.pipeline_mode<synchronous>, transform_indices = @transform_1, window_bounds = array<i64: 1, 64>}, {pipeline_mode = #tpu.pipeline_mode<synchronous>, transform_indices = @transform_2, window_bounds = array<i64: 1, 64>}, {transform_indices = @transform_3, window_bounds = array<i64: 64, 128>}, {transform_indices = @transform_4, window_bounds = array<i64: 16, 128>}]} {
    %c0_i32 = arith.constant 0 : i32
    %0 = arith.cmpi eq, %arg1, %c0_i32 : i32
    %1 = arith.extui %0 : i1 to i32
    %c0_i32_0 = arith.constant 0 : i32
    %2 = arith.cmpi ne, %1, %c0_i32_0 : i32
    scf.if %2 {
      %c0_6 = arith.constant 0 : index
      %c0_7 = arith.constant 0 : index
      %7 = vector.load %arg2[%c0_6, %c0_7] : memref<16x64xf32, #tpu.memory_space<vmem>>, vector<16x64xf32>
      %cst_8 = arith.constant dense<0.000000e+00> : vector<16xf32>
      %8 = vector.multi_reduction <add>, %7, %cst_8 [1] : vector<16x64xf32> to vector<16xf32>
      %9 = vector.shape_cast %8 : vector<16xf32> to vector<16x1xf32>
      %cst_9 = arith.constant 6.400000e+01 : f32
      %10 = vector.broadcast %cst_9 : f32 to vector<16x1xf32>
      %11 = arith.divf %9, %10 : vector<16x1xf32>
      %12 = vector.broadcast %11 : vector<16x1xf32> to vector<16x64xf32>
      %13 = arith.subf %7, %12 : vector<16x64xf32>
      %14 = arith.mulf %13, %13 : vector<16x64xf32>
      %cst_10 = arith.constant dense<0.000000e+00> : vector<16xf32>
      %15 = vector.multi_reduction <add>, %14, %cst_10 [1] : vector<16x64xf32> to vector<16xf32>
      %16 = vector.shape_cast %15 : vector<16xf32> to vector<16x1xf32>
      %cst_11 = arith.constant 6.400000e+01 : f32
      %17 = vector.broadcast %cst_11 : f32 to vector<16x1xf32>
      %18 = arith.divf %16, %17 : vector<16x1xf32>
      %cst_12 = arith.constant 9.99999974E-6 : f32
      %19 = vector.broadcast %cst_12 : f32 to vector<16x1xf32>
      %20 = arith.addf %18, %19 : vector<16x1xf32>
      %21 = math.rsqrt %20 : vector<16x1xf32>
      %22 = vector.broadcast %21 : vector<16x1xf32> to vector<16x64xf32>
      %23 = arith.mulf %13, %22 : vector<16x64xf32>
      %c0_13 = arith.constant 0 : index
      %c0_14 = arith.constant 0 : index
      %24 = vector.load %arg3[%c0_13, %c0_14] : memref<1x64xf32, #tpu.memory_space<vmem>>, vector<1x64xf32>
      %25 = vector.broadcast %24 : vector<1x64xf32> to vector<16x64xf32>
      %26 = arith.mulf %23, %25 : vector<16x64xf32>
      %c0_15 = arith.constant 0 : index
      %c0_16 = arith.constant 0 : index
      %27 = vector.load %arg4[%c0_15, %c0_16] : memref<1x64xf32, #tpu.memory_space<vmem>>, vector<1x64xf32>
      %28 = vector.broadcast %27 : vector<1x64xf32> to vector<16x64xf32>
      %29 = arith.addf %26, %28 : vector<16x64xf32>
      %30 = arith.truncf %29 : vector<16x64xf32> to vector<16x64xbf16>
      %c0_17 = arith.constant 0 : index
      %c0_18 = arith.constant 0 : index
      %31 = vector.load %arg7[%c0_17, %c0_18] : memref<16x64xbf16, #tpu.memory_space<vmem>>, vector<16x64xbf16>
      tpu.vector_store %arg7[%c0_17, %c0_18], %30 {strides = array<i32>} : memref<16x64xbf16, #tpu.memory_space<vmem>>, vector<16x64xbf16>,
    } else {
    }
    %c0 = arith.constant 0 : index
    %c0_1 = arith.constant 0 : index
    %3 = vector.load %arg7[%c0, %c0_1] : memref<16x64xbf16, #tpu.memory_space<vmem>>, vector<16x64xbf16>
    %c0_2 = arith.constant 0 : index
    %c0_3 = arith.constant 0 : index
    %4 = vector.load %arg5[%c0_2, %c0_3] : memref<64x128xbf16, #tpu.memory_space<vmem>>, vector<64x128xbf16>
    %cst = arith.constant dense<0.000000e+00> : vector<16x128xf32>
    %5 = tpu.matmul %3, %4, %cst {dimension_numbers = #tpu.dot_dimension_numbers<[1], [0], [0], [1], [0, 0, 1, 1], [], []>} : vector<16x64xbf16>, vector<64x128xbf16>, vector<16x128xf32> -> vector<16x128xf32>
    %c0_4 = arith.constant 0 : index
    %c0_5 = arith.constant 0 : index
    %6 = vector.load %arg6[%c0_4, %c0_5] : memref<16x128xf32, #tpu.memory_space<vmem>>, vector<16x128xf32>
    tpu.vector_store %arg6[%c0_4, %c0_5], %5 {strides = array<i32>} : memref<16x128xf32, #tpu.memory_space<vmem>>, vector<16x128xf32>,
    return
  }
  func.func @transform_0(%arg0: i32, %arg1: i32) -> (i32, i32) {
    %c0_i32 = arith.constant 0 : i32
    %c0_i32_0 = arith.constant 0 : i32
    return %arg0, %c0_i32 : i32, i32
  }
  func.func @transform_1(%arg0: i32, %arg1: i32) -> (i32, i32) {
    %c0_i32 = arith.constant 0 : i32
    %c0_i32_0 = arith.constant 0 : i32
    %c0_i32_1 = arith.constant 0 : i32
    return %c0_i32, %c0_i32_0 : i32, i32
  }
  func.func @transform_2(%arg0: i32, %arg1: i32) -> (i32, i32) {
    %c0_i32 = arith.constant 0 : i32
    %c0_i32_0 = arith.constant 0 : i32
    %c0_i32_1 = arith.constant 0 : i32
    return %c0_i32, %c0_i32_0 : i32, i32
  }
  func.func @transform_3(%arg0: i32, %arg1: i32) -> (i32, i32) {
    %c0_i32 = arith.constant 0 : i32
    %c0_i32_0 = arith.constant 0 : i32
    return %c0_i32, %arg1 : i32, i32
  }
  func.func @transform_4(%arg0: i32, %arg1: i32) -> (i32, i32) {
    %c0_i32 = arith.constant 0 : i32
    return %arg0, %arg1 : i32, i32
  }
}

</mosaic_0001>

<bundles_post_ra>
// kernel: _lambda_.9
= control target key start
LH: loop header
LB: loop body
LE: loop exit
PB: predicated region body
PF: predicated region fallthrough
CT: control target
= control target key end

     0   :  { %vm24_vm0 = vcmask 523264   ;;  %v389_v16 = vmov 0.0   ;;  %v390_v27 = vmov 0   ;;  %vm391_vm1 = vmmov 0   ;;  %s484_s0 = inlined_call_operand.vmem [shape: f32[16,64], index: 0, kind: input, shape index: {}]   ;;  %s485_s3 = inlined_call_operand.vmem [shape: bf16[64,384], index: 3, kind: input, shape index: {}]   ;;  %s486_s1 = inlined_call_operand.vmem [shape: f32[1,64], index: 1, kind: input, shape index: {}]   ;;  %s487_s2 = inlined_call_operand.vmem [shape: f32[1,64], index: 2, kind: input, shape index: {}]   ;;  %s488_s4 = inlined_call_operand.vmem [shape: bf16[16,384], index: 4, kind: output, shape index: {}]  }
   0x1   :  { %v22_v0 = vld [vmem:[%s484_s0] sm:$0xff]  ;;  %v23_v1 = vld [vmem:[%s484_s0 + $0x8] sm:$0xff]  ;;  %346 = vmatprep.subr.bf16.mxu1 %v389_v16  ;;  %v371_v22 = vld [vmem:[%s485_s3 + $0x30] ss:$12 sps:$4 sm:$0xff]   ;;  %189 = vmatprep.mubr.bf16.mxu0 %v390_v27 }
   0x2   :  { %v25_v2 = vsel %vm24_vm0, %v22_v0, 0.0  ;;  %v28_v3 = vsel %vm24_vm0, %v23_v1, 0.0  ;;  %v361_v14 = vld [vmem:[%s485_s3 + $0x4] ss:$12 sps:$4 sm:$0xff]   ;;  %v363_v15 = vld [vmem:[%s485_s3] ss:$12 sps:$4 sm:$0xff]   ;;  %354 = vmatprep.mubr.msk.bf16.mxu1 %vm391_vm1, %v389_v16 }
   0x3   :  { %26 = vadd.xlane.f32.xlu0 %v25_v2  ;;  %157 = vmatprep.subr.bf16.mxu0 %v361_v14  ;;  %v364_v17 = vld [vmem:[%s485_s3 + $0x8] ss:$12 sps:$4 sm:$0xff]   ;;  %v367_v19 = vld [vmem:[%s485_s3 + $0x18] ss:$12 sps:$4 sm:$0xff]   ;;  %v368_v20 = vld [vmem:[%s485_s3 + $0x20] ss:$12 sps:$4 sm:$0xff]  }
   0x4   :  { %158 = vmatpush1.bf16.msra.mxu0 %v363_v15  ;;  %347 = vmatpush3.bf16.msra.mxu1 %v364_v17  ;;  %v365_v18 = vld [vmem:[%s485_s3 + $0x1c] ss:$12 sps:$4 sm:$0xff]   ;;  %v369_v21 = vld [vmem:[%s485_s3 + $0x34] ss:$12 sps:$4 sm:$0xff]   ;;  %v372_v23 = vld [vmem:[%s485_s3 + $0x38] ss:$12 sps:$4 sm:$0xff]  }
   0x5   :  { %348 = vmatprep.subr.bf16.mxu1 %v389_v16  ;;  %159 = vmatprep.subr.bf16.mxu0 %v365_v18  ;;  %v373_v24 = vld [vmem:[%s485_s3 + $0x4c] ss:$12 sps:$4 sm:$0xff]   ;;  %v375_v25 = vld [vmem:[%s485_s3 + $0x48] ss:$12 sps:$4 sm:$0xff]   ;;  %v376_v26 = vld [vmem:[%s485_s3 + $0x50] ss:$12 sps:$4 sm:$0xff]  }
   0x6   :  { %v317_v36 = vld [vmem:[%s486_s1] ss:$0 sm:$0xff] }
   0x7   :  { %29 = vadd.xlane.f32.xlu0 %v28_v3  ;;  %v318_v40 = vld [vmem:[%s487_s2] ss:$0 sm:$0xff] }
   0x8   :  { %160 = vmatpush1.bf16.msra.mxu0 %v367_v19  ;;  %349 = vmatpush3.bf16.msra.mxu1 %v368_v20 }
   0x9   :  { %350 = vmatprep.subr.bf16.mxu1 %v389_v16  ;;  %161 = vmatprep.subr.bf16.mxu0 %v369_v21 }
   0xc   :  { %162 = vmatpush1.bf16.msra.mxu0 %v371_v22  ;;  %351 = vmatpush3.bf16.msra.mxu1 %v372_v23 }
   0xd   :  { %163 = vmatprep.subr.bf16.mxu0 %v373_v24  ;;  %352 = vmatprep.subr.bf16.mxu1 %v389_v16 }
  0x10   :  { %164 = vmatpush1.bf16.msra.mxu0 %v375_v25  ;;  %353 = vmatpush3.bf16.msra.mxu1 %v376_v26 }
  0x90   :  { %v27_v4 = vpop.xlane.xlu0 %26 }
  0x91   :  { %v32_v5 = vmul.f32 0.015625, %v27_v4 }
  0x93   :  { %v34_v6 = vsub.f32 %v22_v0, %v32_v5 }
  0x94   :  { %v30_v7 = vpop.xlane.xlu0 %29 }
  0x95   :  { %v33_v8 = vmul.f32 0.015625, %v30_v7  ;;  %v36_v9 = vmul.f32 %v34_v6, %v34_v6 }
  0x97   :  { %v35_v10 = vsub.f32 %v23_v1, %v33_v8  ;;  %v38_v11 = vsel %vm24_vm0, %v36_v9, 0.0 }
  0x98   :  { %39 = vadd.xlane.f32.xlu1 %v38_v11 }
  0x99   :  { %v37_v12 = vmul.f32 %v35_v10, %v35_v10 }
  0x9b   :  { %v41_v13 = vsel %vm24_vm0, %v37_v12, 0.0 }
  0x9c   :  { %42 = vadd.xlane.f32.xlu1 %v41_v13 }
 0x125   :  { %v40_v28 = vpop.xlane.xlu1 %39 }
 0x126   :  { %v44_v29 = vmul.f32 0.015625, %v40_v28 }
 0x128   :  { %v46_v30 = vadd.f32 1e-05, %v44_v29 }
 0x129   :  { %v43_v31 = vpop.xlane.xlu1 %42 }
 0x12a   :  { %377 = vrsqrt.f32 %v46_v30  ;;  %v45_v32 = vmul.f32 0.015625, %v43_v31 }
 0x12c   :  { %v47_v33 = vadd.f32 1e-05, %v45_v32 }
 0x12e   :  { %379 = vrsqrt.f32 %v47_v33 }
 0x134   :  { %v378_v34 = vpop.eup %377 }
 0x135   :  { %v50_v35 = vmul.f32 %v378_v34, %v34_v6 }
 0x137   :  { %v59_v38 = vmul.f32 %v317_v36, %v50_v35 }
 0x138   :  { %v380_v37 = vpop.eup %379 }
 0x139   :  { %v51_v39 = vmul.f32 %v380_v37, %v35_v10  ;;  %v68_v42 = vadd.f32 %v318_v40, %v59_v38 }
 0x13b   :  { %v60_v41 = vmul.f32 %v317_v36, %v51_v39 }
 0x13d   :  { %v69_v43 = vadd.f32 %v318_v40, %v60_v41 }
 0x13f   :  { %v70_v44 = vpack.c.bf16 %v69_v43, %v68_v42 }
 0x141   :  { %71 = vst.msk [vmem:[#allocation2] sm:$0xff] %vm24_vm0, %v70_v44 }
 0x148   :  { %v72_v45 = vld [vmem:[#allocation2] sm:$0xff] }
 0x149   :  { %331 = vmatmul.mubr.msk.bf16.vlgmr.msra.gmra.mrb[0].mxu0 %vm24_vm0, %v72_v45  ;;  %355 = vmatmul.mubr.msk.bf16.vlgmr.msra.gmra.mrb[0].mxu1 %vm24_vm0, %v72_v45 }
 0x21c   :  { %v191_v46 = vpop.f32.mrb[0].mxu0  ;;  %v234_v47 = vpop.f32.mrb[0].mxu1 }
 0x21d   :  { %v261_v48 = vmul.f32 0.70710677, %v234_v47  ;;  %v193_v49 = vpop.f32.mrb[1].mxu0  ;;  %v356_v50 = vpop.f32.mrb[1].mxu1  ;;  %v255_v60 = vmul.f32 0.5, %v234_v47 }
 0x21e   :  { %v260_v51 = vmul.f32 0.70710677, %v193_v49  ;;  %v195_v52 = vpop.f32.mrb[2].mxu0  ;;  %v237_v53 = vpop.f32.mrb[2].mxu1  ;;  %v254_v63 = vmul.f32 0.5, %v193_v49 }
 0x21f   :  { %381 = verf.f32 %v261_v48  ;;  %v264_v54 = vmul.f32 0.70710677, %v237_v53  ;;  %v197_v55 = vpop.f32.mrb[3].mxu0  ;;  %v357_v56 = vpop.f32.mrb[3].mxu1  ;;  %v258_v3 = vmul.f32 0.5, %v237_v53 }
 0x220   :  { %383 = verf.f32 %v260_v51  ;;  %v263_v57 = vmul.f32 0.70710677, %v197_v55  ;;  %v257_v6 = vmul.f32 0.5, %v197_v55 }
 0x221   :  { %385 = verf.f32 %v264_v54 }
 0x222   :  { %387 = verf.f32 %v263_v57 }
 0x229   :  { %v382_v58 = vpop.eup %381 }
 0x22a   :  { %v384_v59 = vpop.eup %383  ;;  %v273_v61 = vadd.f32 1.0, %v382_v58 }
 0x22b   :  { %v386_v62 = vpop.eup %385  ;;  %v272_v0 = vadd.f32 1.0, %v384_v59 }
 0x22c   :  { %v388_v1 = vpop.eup %387  ;;  %v279_v2 = vmul.f32 %v273_v61, %v255_v60  ;;  %v276_v4 = vadd.f32 1.0, %v386_v62 }
 0x22d   :  { %v278_v5 = vmul.f32 %v272_v0, %v254_v63  ;;  %v275_v7 = vadd.f32 1.0, %v388_v1 }
 0x22e   :  { %v338_v8 = vpack.c.bf16 %v279_v2, %v279_v2  ;;  %v282_v9 = vmul.f32 %v276_v4, %v258_v3 }
 0x22f   :  { %v337_v10 = vpack.c.bf16 %v278_v5, %v191_v46  ;;  %v281_v11 = vmul.f32 %v275_v7, %v257_v6 }
 0x230   :  { %310 = vst [vmem:[%s488_s4 + $0x8] sm:$0xf] %v338_v8  ;;  %v340_v12 = vpack.c.bf16 %v282_v9, %v282_v9 }
 0x231   :  { %309 = vst [vmem:[%s488_s4] sm:$0xff] %v337_v10  ;;  %v339_v13 = vpack.c.bf16 %v281_v11, %v195_v52 }
 0x232   :  { %312 = vst [vmem:[%s488_s4 + $0x14] sm:$0xf] %v340_v12 }
 0x233   :  { %311 = vst [vmem:[%s488_s4 + $0xc] sm:$0xff] %v339_v13 }

// kernel: _lambda_.10
= control target key start
LH: loop header
LB: loop body
LE: loop exit
PB: predicated region body
PF: predicated region fallthrough
CT: control target
= control target key end

     0   :  { %s748_s12 = smov 0   ;;  %s750_s13 = smov 0   ;;  %s825_s0 = inlined_call_operand.vmem [shape: bf16[2,4,8,16], index: 0, kind: input, shape index: {}]   ;;  %s826_s1 = inlined_call_operand.vmem [shape: bf16[2,8,16], index: 1, kind: input, shape index: {}]   ;;  %s827_s2 = inlined_call_operand.vmem [shape: bf16[2,8,16], index: 2, kind: input, shape index: {}]   ;;  %s828_s3 = inlined_call_operand.vmem [shape: bf16[2,4,8,16], index: 3, kind: output, shape index: {}]  }
   0x1   :  { %s752_s14 = smov 0   ;;  %s754_s15 = smov 0  }
   0x2   :  { %s756_s16 = smov 0  }
   0x3 LB: > { %s35_s17 = sadd.s32 1, %s714_s14  ;;  %s39_s18 = sadd.s32 1, %s718_s15  ;;  %s722_s16 = sphi %s756_s16, %s13_s16   ;;  %s718_s15 = sphi %s754_s15, %s832_s15   ;;  %s714_s14 = sphi %s752_s14, %s831_s14   ;;  %s710_s13 = sphi %s750_s13, %s830_s13   ;;  %s706_s12 = sphi %s748_s12, %s829_s12  }
   0x4   : > { %p37_p0 = scmp.ge.s32.totalorder %s35_s17, 4  ;;  %p605_p1 = scmp.ge.s32.totalorder %s722_s16, 1 }
   0x5   : > { %p205_p2 = scmp.lt.s32.totalorder %s722_s16, 9 }
   0x6   : > { %s834_s17 = smov (%p37_p0, %s35_s17), 0  ;;  %s836_s18 = smov (!%p37_p0, %s39_s18), %s718_s15 }
   0x7   : > { %p206_p3 = pnand %p605_p1, %p205_p2  ;;  %p41_p4 = scmp.ge.s32.totalorder %s836_s18, 2 }
   0x8   : > { %p255_p5 = scmp.lt.s32.totalorder (!%p206_p3), %s710_s13, 1  ;;  %vm299_vm0 = vcmask (!%p206_p3), 130048   ;;  %p257_p6 = scmp.lt.s32.totalorder (!%p206_p3), %s706_s12, 3  ;;  %v724_v0 = vmov (!%p206_p3), 0.0   ;;  %vm725_vm1 = vmmov (!%p206_p3), 0   ;;  %vm296_vm2 = vcmask (!%p206_p3), 7168  }
   0x9   : > { %s838_s18 = smov (%p41_p4, %s836_s18), 0  ;;  %209 = sbr.rel (%p206_p3) target bundleno = 826 (0x33a), region = 32 }
   0xa   : > { %620 = vmatprep.subr.bf16.mxu0 (!%p206_p3), %v724_v0  ;;  %300 = vst.msk [vmem:[#allocation4] sm:$0xff] (!%p206_p3), %vm299_vm0, %v724_v0  ;;  %622 = vmatprep.mubr.msk.bf16.mxu0 (!%p206_p3), %vm725_vm1, %v724_v0  ;;  %v726_v4 = vmov (!%p206_p3), -inf   ;;  %v357_v5 = vlaneseq (!%p206_p3)  ;;  %vm368_vm4 = vcmask (!%p206_p3), 64512   ;;  %v727_v14 = vmov (!%p206_p3), 0  }
   0xb   : > { %626 = vmatprep.subr.bf16.mxu1 (!%p206_p3), %v724_v0  ;;  %628 = vmatprep.mubr.msk.bf16.mxu1 (!%p206_p3), %vm725_vm1, %v724_v0  ;;  %297 = vst.msk [vmem:[#allocation2] sm:$0xff] (!%p206_p3), %vm296_vm2, %v726_v4  ;;  %298 = vst.msk [vmem:[#allocation3] sm:$0xff] (!%p206_p3), %vm296_vm2, %v724_v0  ;;  %vm404_vm5 = vcmask (!%p206_p3), 1043456   ;;  %vm464_vm6 = vcmask (!%p206_p3), 125952  }
   0xc   : > { %v358_v6 = vshrl.u32 (!%p206_p3), %v357_v5, 7  ;;  %v362_v7 = vand.u32 (!%p206_p3), 127, %v357_v5  ;;  %676 = vset.pattern.permute.xlu0 (!%p206_p3), %v727_v14  ;;  %677 = vset.pattern.permute.xlu1 (!%p206_p3), %v727_v14 }
   0xe   : > { %vm365_vm3 = vcmp.gt.s32.totalorder (!%p206_p3), %v362_v7, %v358_v6 }
  0x10   : > { %s840_s13 = smov (!%p255_p5, %s710_s13), 1  ;;  %s842_s12 = smov (!%p257_p6, %s706_s12), 3 }
  0x11   : > { %s779_s19 = sshll.u32 %s840_s13, 2  ;;  %v392_v34 = vld [vmem:[#allocation4] sm:$0xff] }
  0x12   : > { %s272_s22 = scalar_lea.vmem %s826_s1, %s779_s19  ;;  %s263_s23 = sadd.s32 %s779_s19, %s842_s12  ;;  %v367_v15 = vld [vmem:[#allocation2] sm:$0xff]  ;;  %v384_v29 = vld [vmem:[#allocation3] sm:$0xff] }
  0x13   : > { %v309_v1 = vld [vmem:[%s272_s22] sm:$0xf]  ;;  %s786_s24 = sshll.u32 %s263_s23, 2  ;;  %s279_s30 = scalar_lea.vmem %s827_s2, %s779_s19 }
  0x14   : > { %v315_v2 = vsel %vm299_vm0, %v309_v1, 0  ;;  %s265_s27 = scalar_lea.vmem %s825_s0, %s786_s24  ;;  %v400_v19 = vld [vmem:[%s279_s30] sm:$0xf]  ;;  %s290_s6 = scalar_lea.vmem %s828_s3, %s786_s24 }
  0x15   : > { %621 = vmatpush3.bf16.xpose.msra.mxu0 %v315_v2  ;;  %v308_v3 = vld [vmem:[%s265_s27] sm:$0xf]  ;;  %v406_v20 = vsel %vm404_vm5, %v400_v19, 0 }
  0x16   : > { %627 = vmatpush3.bf16.msra.mxu1 %v406_v20 }
  0x1c   : > { %623 = vmatmul.mubr.msk.bf16.vlgmr.msra.gmra.mrb[0].mxu0 %vm299_vm0, %v308_v3 }
  0xef   : > { %v351_v8 = vpop.f32.mrb[0].mxu0 }
  0xf0   : > { %v366_v9 = vsel %vm365_vm3, -inf, %v351_v8  ;;  %v624_v10 = vpop.f32.mrb[1].mxu0 }
  0xf1   : > { %v354_v11 = vpop.f32.mrb[2].mxu0  ;;  %v369_v12 = vsel %vm368_vm4, %v366_v9, -inf }
  0xf2   : > { %370 = vmax.xlane.f32.xlu0 %v369_v12  ;;  %v625_v13 = vpop.f32.mrb[3].mxu0 }
 0x17f   : > { %v371_v16 = vpop.xlane.xlu0 %370 }
 0x180   : > { %v372_v17 = vmax.f32 %v367_v15, %v371_v16 }
 0x182   : > { %v373_v18 = vsub.f32 %v367_v15, %v372_v17  ;;  %450 = vst.msk [vmem:[#allocation2] sm:$0xff] %vm296_vm2, %v372_v17  ;;  %378 = vperm.xlu0 %676, %v372_v17  }
 0x184   : > { %v374_v27 = vmul.f32 1.442695, %v373_v18 }
 0x201   : > { %v379_v21 = vpop.permute.xlu0 %378 }
 0x202   : > { %v381_v22 = vsub.f32 %v366_v9, %v379_v21 }
 0x204   : > { %v382_v23 = vmul.f32 1.442695, %v381_v22 }
 0x206   : > { %678 = vpow2.f32 %v382_v23 }
 0x207   : > { %680 = vpow2.f32 %v374_v27 }
 0x210   : > { %v679_v24 = vpop.eup %678 }
 0x211   : > { %v386_v25 = vsel %vm368_vm4, %v679_v24, 0.0  ;;  %v399_v26 = vpack.c.bf16 %v679_v24, %v679_v24  ;;  %v681_v28 = vpop.eup %680 }
 0x212   : > { %387 = vadd.xlane.f32.xlu1 %v386_v25  ;;  %v385_v30 = vmul.f32 %v681_v28, %v384_v29 }
 0x213   : > { %629 = vmatmul.mubr.msk.bf16.vlgmr.msra.gmra.mrb[0].mxu1 %vm368_vm4, %v399_v26 }
 0x223   : > { %395 = vperm.xlu1 %677, %v681_v28  }
 0x29f   : > { %v388_v31 = vpop.xlane.xlu1 %387 }
 0x2a0   : > { %v389_v32 = vadd.f32 %v388_v31, %v385_v30 }
 0x2a2   : > { %391 = vst.msk [vmem:[#allocation3] sm:$0xff] %vm296_vm2, %v389_v32 }
 0x2a3   : > { %v396_v35 = vpop.permute.xlu1 %395 }
 0x2a4   : > { %v398_v36 = vmul.f32 %v396_v35, %v392_v34 }
 0x2a9   : > { %v455_v33 = vld [vmem:[#allocation3] sm:$0xff] }
 0x2aa   : > { %458 = vperm.xlu1 %677, %v455_v33  }
 0x2e6   : > { %v442_v37 = vpop.f32.mrb[0].mxu1 }
 0x2e7   : > { %v448_v38 = vadd.f32 %v442_v37, %v398_v36  ;;  %v630_v39 = vpop.f32.mrb[1].mxu1 }
 0x2e8   : > { %v445_v40 = vpop.f32.mrb[2].mxu1 }
 0x2e9   : > { %449 = vst.msk [vmem:[#allocation4] sm:$0xff] %vm299_vm0, %v448_v38  ;;  %v631_v41 = vpop.f32.mrb[3].mxu1 }
 0x2f0   : > { %v454_v44 = vld [vmem:[#allocation4] sm:$0xff] }
 0x329   : > { %v459_v42 = vpop.permute.xlu1 %458 }
 0x32a   : > { %682 = vrcp.f32 %v459_v42 }
 0x334   : > { %v683_v43 = vpop.eup %682 }
 0x335   : > { %v462_v45 = vmul.f32 %v683_v43, %v454_v44 }
 0x337   : > { %v463_v46 = vpack.c.bf16 %v462_v45, %v462_v45 }
 0x339   : > { %465 = vst.msk [vmem:[%s290_s6] sm:$0xf] %vm464_vm6, %v463_v46 }
 0x33a PF: > { %s13_s16 = sadd.s32 1, %s722_s16   ;;  %s829_s12 = smov %s714_s14 }
 0x33b   : > { %p10_p7 = scmp.ge.s32.totalorder %s13_s16, 10   ;;  %s830_s13 = smov %s718_s15 }
 0x33c   : > { %s831_s14 = smov %s834_s17  ;;  %s832_s15 = smov %s838_s18 }
 0x33d   :  { %12 = sbr.rel (!%p10_p7) target bundleno = 3 (0x3), region = 80 }

// kernel: _lambda_.11
= control target key start
LH: loop header
LB: loop body
LE: loop exit
PB: predicated region body
PF: predicated region fallthrough
CT: control target
= control target key end

     0   :  { %vm19_vm0 = vcmask 523264   ;;  %v157_v0 = vmov 0.0   ;;  %vm158_vm1 = vmmov 0   ;;  %s213_s1 = inlined_call_operand.vmem [shape: bf16[64,64], index: 1, kind: input, shape index: {}]   ;;  %s214_s0 = inlined_call_operand.vmem [shape: bf16[16,64], index: 0, kind: input, shape index: {}]   ;;  %s215_s2 = inlined_call_operand.vmem [shape: f32[16,64], index: 2, kind: input, shape index: {}]   ;;  %s216_s3 = inlined_call_operand.vmem [shape: f32[16,64], index: 3, kind: output, shape index: {}]  }
   0x1   :  { %138 = vmatprep.subr.bf16.mxu0 %v157_v0  ;;  %v152_v1 = vld [vmem:[%s213_s1] sm:$0xff]   ;;  %146 = vmatprep.mubr.msk.bf16.mxu0 %vm158_vm1, %v157_v0  ;;  %20 = vst.msk [vmem:[#allocation2] sm:$0xff] %vm19_vm0, %v157_v0  ;;  %21 = vst.msk [vmem:[#allocation2 + $0x8] sm:$0xff] %vm19_vm0, %v157_v0  ;;  %v153_v2 = vld [vmem:[%s213_s1 + $0x8] sm:$0xff]  }
   0x2   :  { %139 = vmatpush3.bf16.msra.mxu0 %v152_v1  ;;  %v154_v3 = vld [vmem:[%s213_s1 + $0x10] sm:$0xff]   ;;  %v155_v4 = vld [vmem:[%s213_s1 + $0x18] sm:$0xff]   ;;  %v156_v5 = vld [vmem:[%s214_s0] sm:$0xff]  }
   0x3   :  { %140 = vmatprep.subr.bf16.mxu0 %v157_v0  ;;  %v117_v14 = vld [vmem:[%s215_s2] sm:$0xff]  ;;  %v118_v16 = vld [vmem:[%s215_s2 + $0x8] sm:$0xff] }
   0x6   :  { %141 = vmatpush3.bf16.msra.mxu0 %v153_v2 }
   0x7   :  { %142 = vmatprep.subr.bf16.mxu0 %v157_v0 }
   0x8   :  { %v22_v6 = vld [vmem:[#allocation2] sm:$0xff]  ;;  %v23_v8 = vld [vmem:[#allocation2 + $0x8] sm:$0xff] }
   0xa   :  { %143 = vmatpush3.bf16.msra.mxu0 %v154_v3 }
   0xb   :  { %144 = vmatprep.subr.bf16.mxu0 %v157_v0 }
   0xe   :  { %145 = vmatpush3.bf16.msra.mxu0 %v155_v4 }
  0x11   :  { %147 = vmatmul.mubr.msk.bf16.vlgmr.msra.gmra.mrb[0].mxu0 %vm19_vm0, %v156_v5 }
  0xe4   :  { %v101_v7 = vpop.f32.mrb[0].mxu0 }
  0xe5   :  { %v108_v9 = vadd.f32 %v101_v7, %v22_v6  ;;  %v148_v10 = vpop.f32.mrb[1].mxu0 }
  0xe6   :  { %v104_v11 = vpop.f32.mrb[2].mxu0 }
  0xe7   :  { %110 = vst.msk [vmem:[#allocation2] sm:$0xff] %vm19_vm0, %v108_v9  ;;  %v109_v12 = vadd.f32 %v104_v11, %v23_v8  ;;  %v149_v13 = vpop.f32.mrb[3].mxu0 }
  0xe9   :  { %111 = vst.msk [vmem:[#allocation2 + $0x8] sm:$0xff] %vm19_vm0, %v109_v12 }
  0xee   :  { %v115_v15 = vld [vmem:[#allocation2] sm:$0xff] }
  0xef   :  { %v119_v17 = vadd.f32 %v117_v14, %v115_v15 }
  0xf0   :  { %v116_v18 = vld [vmem:[#allocation2 + $0x8] sm:$0xff] }
  0xf1   :  { %121 = vst.msk [vmem:[%s216_s3] sm:$0xff] %vm19_vm0, %v119_v17  ;;  %v120_v19 = vadd.f32 %v118_v16, %v116_v18 }
  0xf3   :  { %122 = vst.msk [vmem:[%s216_s3 + $0x8] sm:$0xff] %vm19_vm0, %v120_v19 }

// kernel: _lambda_.12
= control target key start
LH: loop header
LB: loop body
LE: loop exit
PB: predicated region body
PF: predicated region fallthrough
CT: control target
= control target key end

     0   :  { %vm19_vm0 = vcmask 523264   ;;  %v285_v18 = vmov 0.0   ;;  %s378_s1 = inlined_call_operand.vmem [shape: bf16[256,64], index: 1, kind: input, shape index: {}]   ;;  %s379_s0 = inlined_call_operand.vmem [shape: bf16[16,256], index: 0, kind: input, shape index: {}]   ;;  %s380_s2 = inlined_call_operand.vmem [shape: f32[16,64], index: 2, kind: input, shape index: {}]   ;;  %s381_s3 = inlined_call_operand.vmem [shape: f32[16,64], index: 3, kind: output, shape index: {}]  }
   0x1   :  { %v266_v0 = vld [vmem:[%s378_s1 + $0x40] sm:$0xff]   ;;  %v268_v2 = vld [vmem:[%s378_s1 + $0x48] sm:$0xff]   ;;  %v270_v4 = vld [vmem:[%s378_s1 + $0x50] sm:$0xff]   ;;  %20 = vst.msk [vmem:[#allocation2] sm:$0xff] %vm19_vm0, %v285_v18 }
   0x2   :  { %v267_v1 = vld [vmem:[%s378_s1] sm:$0xff]   ;;  %243 = vmatprep.subr.bf16.mxu0 %v266_v0  ;;  %v269_v3 = vld [vmem:[%s378_s1 + $0x8] sm:$0xff]   ;;  %v271_v5 = vld [vmem:[%s378_s1 + $0x10] sm:$0xff]   ;;  %21 = vst.msk [vmem:[#allocation2 + $0x8] sm:$0xff] %vm19_vm0, %v285_v18 }
   0x3   :  { %244 = vmatpush3.bf16.msra.mxu0 %v267_v1  ;;  %v272_v6 = vld [vmem:[%s378_s1 + $0x58] sm:$0xff]   ;;  %v274_v8 = vld [vmem:[%s378_s1 + $0x60] sm:$0xff]   ;;  %v276_v10 = vld [vmem:[%s378_s1 + $0x68] sm:$0xff]  }
   0x4   :  { %245 = vmatprep.subr.bf16.mxu0 %v268_v2  ;;  %v273_v7 = vld [vmem:[%s378_s1 + $0x18] sm:$0xff]   ;;  %v275_v9 = vld [vmem:[%s378_s1 + $0x20] sm:$0xff]   ;;  %v277_v12 = vld [vmem:[%s378_s1 + $0x28] sm:$0xff]  }
   0x5   :  { %v284_v11 = vld [vmem:[%s379_s0 + $0x4] ss:$8 sps:$4 sm:$0xff]   ;;  %v278_v13 = vld [vmem:[%s378_s1 + $0x70] sm:$0xff]   ;;  %v280_v15 = vld [vmem:[%s378_s1 + $0x78] sm:$0xff]  }
   0x6   :  { %196 = vmatprep.mubr.bf16.mxu0 %v284_v11  ;;  %v279_v14 = vld [vmem:[%s378_s1 + $0x30] sm:$0xff]   ;;  %v281_v16 = vld [vmem:[%s378_s1 + $0x38] sm:$0xff]   ;;  %v282_v17 = vld [vmem:[%s379_s0] ss:$8 sps:$4 sm:$0xff]  }
   0x7   :  { %246 = vmatpush3.bf16.msra.mxu0 %v269_v3  ;;  %v215_v29 = vld [vmem:[%s380_s2] sm:$0xff]  ;;  %v216_v31 = vld [vmem:[%s380_s2 + $0x8] sm:$0xff] }
   0x8   :  { %247 = vmatprep.subr.bf16.mxu0 %v270_v4  ;;  %v22_v20 = vld [vmem:[#allocation2] sm:$0xff] }
   0x9   :  { %v23_v24 = vld [vmem:[#allocation2 + $0x8] sm:$0xff] }
   0xb   :  { %248 = vmatpush3.bf16.msra.mxu0 %v271_v5 }
   0xc   :  { %249 = vmatprep.subr.bf16.mxu0 %v272_v6 }
   0xf   :  { %250 = vmatpush3.bf16.msra.mxu0 %v273_v7 }
  0x10   :  { %251 = vmatprep.subr.bf16.mxu0 %v274_v8 }
  0x13   :  { %252 = vmatpush3.bf16.msra.mxu0 %v275_v9 }
  0x14   :  { %253 = vmatprep.subr.bf16.mxu0 %v276_v10 }
  0x17   :  { %254 = vmatpush3.bf16.msra.mxu0 %v277_v12 }
  0x18   :  { %255 = vmatprep.subr.bf16.mxu0 %v278_v13 }
  0x1b   :  { %256 = vmatpush3.bf16.msra.mxu0 %v279_v14 }
  0x1c   :  { %257 = vmatprep.subr.bf16.mxu0 %v280_v15 }
  0x1f   :  { %258 = vmatpush3.bf16.msra.mxu0 %v281_v16 }
  0x22   :  { %197 = vmatmul.mubr.bf16.vlgmr.msra.gmra.mrb[0].mxu0 %v282_v17 }
  0xf5   :  { %v259_v19 = vpop.f32.mrb[0].mxu0 }
  0xf6   :  { %v260_v21 = vpop.f32.mrb[1].mxu0 }
  0xf7   :  { %v261_v22 = vadd.f32 %v260_v21, %v259_v19  ;;  %v262_v23 = vpop.f32.mrb[2].mxu0 }
  0xf8   :  { %v263_v25 = vpop.f32.mrb[3].mxu0 }
  0xf9   :  { %v205_v26 = vadd.f32 %v261_v22, %v22_v20  ;;  %v264_v27 = vadd.f32 %v263_v25, %v262_v23 }
  0xfb   :  { %208 = vst.msk [vmem:[#allocation2] sm:$0xff] %vm19_vm0, %v205_v26  ;;  %v206_v28 = vadd.f32 %v264_v27, %v23_v24 }
  0xfd   :  { %209 = vst.msk [vmem:[#allocation2 + $0x8] sm:$0xff] %vm19_vm0, %v206_v28 }
 0x102   :  { %v213_v30 = vld [vmem:[#allocation2] sm:$0xff] }
 0x103   :  { %v217_v32 = vadd.f32 %v215_v29, %v213_v30 }
 0x104   :  { %v214_v33 = vld [vmem:[#allocation2 + $0x8] sm:$0xff] }
 0x105   :  { %219 = vst.msk [vmem:[%s381_s3] sm:$0xff] %vm19_vm0, %v217_v32  ;;  %v218_v34 = vadd.f32 %v216_v31, %v214_v33 }
 0x107   :  { %220 = vst.msk [vmem:[%s381_s3 + $0x8] sm:$0xff] %vm19_vm0, %v218_v34 }

// kernel: _lambda_.17
= control target key start
LH: loop header
LB: loop body
LE: loop exit
PB: predicated region body
PF: predicated region fallthrough
CT: control target
= control target key end

     0   :  { %vm25_vm0 = vcmask 523264   ;;  %s302_s0 = inlined_call_operand.vmem [shape: f32[16,64], index: 0, kind: input, shape index: {}]   ;;  %s303_s1 = inlined_call_operand.vmem [shape: f32[1,64], index: 1, kind: input, shape index: {}]   ;;  %s304_s2 = inlined_call_operand.vmem [shape: f32[1,64], index: 2, kind: input, shape index: {}]   ;;  %s305_s3 = inlined_call_operand.vmem [shape: bf16[64,128], index: 3, kind: input, shape index: {}]   ;;  %s306_s4 = inlined_call_operand.hbm [shape: f32[16,128], index: 4, kind: output, shape index: {}]  }
   0x1   :  { %v23_v0 = vld [vmem:[%s302_s0] sm:$0xff]  ;;  %v24_v1 = vld [vmem:[%s302_s0 + $0x8] sm:$0xff] }
   0x2   :  { %v26_v2 = vsel %vm25_vm0, %v23_v0, 0.0  ;;  %v29_v3 = vsel %vm25_vm0, %v24_v1, 0.0 }
   0x3   :  { %27 = vadd.xlane.f32.xlu0 %v26_v2 }
   0x4   :  { %9 = vsyncpa [#allocation4], 0  ;;  %v198_v14 = vld [vmem:[%s305_s3] sm:$0xff]   ;;  %v230_v15 = vmov 0.0   ;;  %v199_v16 = vld [vmem:[%s305_s3 + $0x8] sm:$0xff]   ;;  %vm231_vm1 = vmmov 0  }
   0x5   :  { %181 = vmatprep.subr.bf16.mxu0 %v230_v15  ;;  %v200_v17 = vld [vmem:[%s305_s3 + $0x10] sm:$0xff]   ;;  %v201_v18 = vld [vmem:[%s305_s3 + $0x18] sm:$0xff]   ;;  %189 = vmatprep.mubr.msk.bf16.mxu0 %vm231_vm1, %v230_v15  ;;  %v169_v27 = vld [vmem:[%s303_s1] ss:$0 sm:$0xff]  ;;  %s232_s29 = smov [#allocation3]  }
   0x6   :  { %182 = vmatpush3.bf16.msra.mxu0 %v198_v14  ;;  %v170_v31 = vld [vmem:[%s304_s2] ss:$0 sm:$0xff]  ;;  %s158_s30 = sshll.u32 %s232_s29, 4  ;;  %s159_s30 = int_to_ptr.vmem [resolvable:$true] %s158_s30 }
   0x7   :  { %30 = vadd.xlane.f32.xlu0 %v29_v3  ;;  %183 = vmatprep.subr.bf16.mxu0 %v230_v15  ;;  %s206_s1 = scalar_lea.vmem %s159_s30, 256  ;;  %p211_p1 = scmp.lt.s32.totalorder %s159_s30, %s159_s30 }
   0x8   :  { %p207_p0 = scmp.ne.s32.totalorder %s159_s30, %s206_s1  ;;  %p212_p2 = scmp.lt.s32.totalorder %s206_s1, %s206_s1 }
   0xa   :  { %184 = vmatpush3.bf16.msra.mxu0 %v199_v16  ;;  %p213_p3 = por %p212_p2, %p211_p1 }
   0xb   :  { %185 = vmatprep.subr.bf16.mxu0 %v230_v15 }
   0xc   :  { %p214_p4 = pnand %p213_p3, %p207_p0 }
   0xe   :  { %186 = vmatpush3.bf16.msra.mxu0 %v200_v17 }
   0xf   :  { %187 = vmatprep.subr.bf16.mxu0 %v230_v15 }
  0x12   :  { %188 = vmatpush3.bf16.msra.mxu0 %v201_v18 }
  0x90   :  { %v28_v4 = vpop.xlane.xlu0 %27 }
  0x91   :  { %v33_v5 = vmul.f32 0.015625, %v28_v4 }
  0x93   :  { %v35_v6 = vsub.f32 %v23_v0, %v33_v5 }
  0x94   :  { %v31_v7 = vpop.xlane.xlu0 %30 }
  0x95   :  { %v34_v8 = vmul.f32 0.015625, %v31_v7  ;;  %v37_v9 = vmul.f32 %v35_v6, %v35_v6 }
  0x97   :  { %v36_v10 = vsub.f32 %v24_v1, %v34_v8  ;;  %v39_v11 = vsel %vm25_vm0, %v37_v9, 0.0 }
  0x98   :  { %40 = vadd.xlane.f32.xlu1 %v39_v11 }
  0x99   :  { %v38_v12 = vmul.f32 %v36_v10, %v36_v10 }
  0x9b   :  { %v42_v13 = vsel %vm25_vm0, %v38_v12, 0.0 }
  0x9c   :  { %43 = vadd.xlane.f32.xlu1 %v42_v13 }
 0x125   :  { %v41_v19 = vpop.xlane.xlu1 %40 }
 0x126   :  { %v45_v20 = vmul.f32 0.015625, %v41_v19 }
 0x128   :  { %v47_v21 = vadd.f32 1e-05, %v45_v20 }
 0x129   :  { %v44_v22 = vpop.xlane.xlu1 %43 }
 0x12a   :  { %202 = vrsqrt.f32 %v47_v21  ;;  %v46_v23 = vmul.f32 0.015625, %v44_v22 }
 0x12c   :  { %v48_v24 = vadd.f32 1e-05, %v46_v23 }
 0x12e   :  { %204 = vrsqrt.f32 %v48_v24 }
 0x134   :  { %v203_v25 = vpop.eup %202 }
 0x135   :  { %v51_v26 = vmul.f32 %v203_v25, %v35_v6 }
 0x137   :  { %v60_v29 = vmul.f32 %v169_v27, %v51_v26 }
 0x138   :  { %v205_v28 = vpop.eup %204 }
 0x139   :  { %v52_v30 = vmul.f32 %v205_v28, %v36_v10  ;;  %v69_v33 = vadd.f32 %v170_v31, %v60_v29 }
 0x13b   :  { %v61_v32 = vmul.f32 %v169_v27, %v52_v30 }
 0x13d   :  { %v70_v34 = vadd.f32 %v170_v31, %v61_v32 }
 0x13f   :  { %v71_v35 = vpack.c.bf16 %v70_v34, %v69_v33 }
 0x141   :  { %72 = vst.msk [vmem:[#allocation2] sm:$0xff] %vm25_vm0, %v71_v35 }
 0x148   :  { %v73_v36 = vld [vmem:[#allocation2] sm:$0xff] }
 0x149   :  { %190 = vmatmul.mubr.msk.bf16.vlgmr.msra.gmra.mrb[0].mxu0 %vm25_vm0, %v73_v36 }
 0x21c   :  { %v144_v37 = vpop.f32.mrb[0].mxu0 }
 0x21d   :  { %151 = vst [vmem:[#allocation3] sm:$0xff] %v144_v37  ;;  %v191_v38 = vpop.f32.mrb[1].mxu0 }
 0x21e   :  { %v147_v39 = vpop.f32.mrb[2].mxu0 }
 0x21f   :  { %152 = vst [vmem:[#allocation3 + $0x8] sm:$0xff] %v147_v39  ;;  %v192_v40 = vpop.f32.mrb[3].mxu0 }
 0x220   :  { %217 = shalt.err (!%p214_p4)
}
 0x221   :  { %s218_s6 = scalar_lea.hbm %s306_s4, 256 }
 0x222   :  { %p219_p5 = scmp.ne.s32.totalorder %s306_s4, %s218_s6  ;;  %p222_p6 = scmp.lt.u32.totalorder %s218_s6, %s306_s4 }
 0x224   :  { %p224_p7 = pnand %p222_p6, %p219_p5 }
 0x226   :  { %227 = shalt.err (!%p224_p7)
}
 0x227   :  { %s233_s11 = smov 128   ;;  %s234_s12 = smov 8  }
 0x228   :  { %164 = dma.vmem_to_hbm [thread:$0]  %s159_s30, 256, %s306_s4, [#allocation4], %s233_s11, %s233_s11, %s234_s12  }
 0x229   :  { %228 = dma.done.wait [#allocation4], 256  }
 0x22a   :  { %229 = vsyncadd [#allocation4], 4294967040 }
 0x22b   :  { %168 = vsyncpa [#allocation4], 1 }

</bundles_post_ra>
